<compile_context>
chip_gen: v7x
topology: tpu7x:2x2x1
jax: 0.10.0
libtpu: 0.0.40
codegen_flags: <defaults>
</compile_context>

<pallas_src>
import functools

import jax
import jax.numpy as jnp
from jax import lax
from jax.experimental import pallas as pl
from jax.experimental.pallas import tpu as pltpu


def _round_up(x, m):
    return -(-x // m) * m


def _sigmoid(x):
    # sigmoid via tanh: one EUP op + cheap VPU add/mul (review item).
    return 0.5 * (jnp.tanh(0.5 * x) + 1.0)


def _tagger_kernel(ids_ref, table_ref, wih_ref, whh_ref, b_ref, wout_ref,
                   bout_ref, out_ref, gx_scr, hall_scr, *, T, Bp):
    """Fused Embedding + LSTM + Linear + log_softmax forward.

    ids_ref   : (T*Bp, 1)  int32 token ids, time-major (row = t*Bp + b)
    table_ref : (Vp, Ep)   bf16 embedding table (zero padded)
    wih_ref   : (Ep, 4Hp)  bf16 input->gates weights (pre-transposed, padded)
    whh_ref   : (Hp, 4Hp)  bf16 hidden->gates weights (pre-transposed, padded)
    b_ref     : (1, 4Hp)   f32 bias_ih + bias_hh (padded entries = 0)
    wout_ref  : (Hp, Cp)   bf16 hidden2tag weights (zero padded)
    bout_ref  : (1, Cp)    f32 hidden2tag bias, padded columns = -1e30
    out_ref   : (Bp, T*Cp) f32 log-softmax scores, batch-major, lane-dense
    gx_scr    : (T*Bp, 4Hp) f32 scratch: input-gate preactivations
    hall_scr  : (T*Bp, Hp)  f32 scratch: all hidden states
    """
    Hp = whh_ref.shape[0]
    Cp = wout_ref.shape[1]
    Vp = table_ref.shape[0]
    TB = T * Bp

    # ---- Phase 1: in-kernel embedding gather (one-hot MXU matmul) + batched
    #      input->gates projection, all off the serial path. -------------------
    ids = ids_ref[...]                                            # (TB, 1) i32
    iota_v = lax.broadcasted_iota(jnp.int32, (TB, Vp), 1)
    onehot = jnp.where(ids == iota_v, jnp.float32(1.0),
                       jnp.float32(0.0)).astype(jnp.bfloat16)     # (TB, Vp)
    emb = jnp.dot(onehot, table_ref[...],
                  preferred_element_type=jnp.float32)             # (TB, Ep)
    gx_scr[...] = jnp.dot(emb.astype(jnp.bfloat16), wih_ref[...],
                          preferred_element_type=jnp.float32) + b_ref[...]

    # Hoist loop-invariant hidden->gates weights (bf16).
    whh = whh_ref[...]

    # ---- Phase 2: serial LSTM recurrence. PyTorch gate order: i, f, g, o. ----
    # Peeled t = 0: h0 = c0 = 0, so the h @ W_hh matmul and the f-gate vanish.
    g0 = gx_scr[0:Bp, :]                                          # (Bp, 4Hp)
    i0 = _sigmoid(g0[:, 0:Hp])
    gg0 = jnp.tanh(g0[:, 2 * Hp:3 * Hp])
    o0 = _sigmoid(g0[:, 3 * Hp:4 * Hp])
    c1 = i0 * gg0
    h1 = o0 * jnp.tanh(c1)
    hall_scr[0:Bp, :] = h1

    def step(t, carry):
        h, c = carry
        start = pl.multiple_of(t * Bp, Bp)
        gates = gx_scr[pl.ds(start, Bp), :] + jnp.dot(
            h.astype(jnp.bfloat16), whh, preferred_element_type=jnp.float32)
        i = _sigmoid(gates[:, 0:Hp])
        f = _sigmoid(gates[:, Hp:2 * Hp])
        g = jnp.tanh(gates[:, 2 * Hp:3 * Hp])
        o = _sigmoid(gates[:, 3 * Hp:4 * Hp])
        c_new = f * c + i * g
        h_new = o * jnp.tanh(c_new)
        hall_scr[pl.ds(start, Bp), :] = h_new
        return (h_new, c_new)

    lax.fori_loop(1, T, step, (h1, c1), unroll=True)

    # ---- Phase 3: batched hidden2tag projection + log_softmax, batch-major
    #      lane-dense store (Bp, T*Cp). ---------------------------------------
    logits = jnp.dot(hall_scr[...].astype(jnp.bfloat16), wout_ref[...],
                     preferred_element_type=jnp.float32) + bout_ref[...]
    m = jnp.max(logits, axis=-1, keepdims=True)
    lse = m + jnp.log(jnp.sum(jnp.exp(logits - m), axis=-1, keepdims=True))
    lp = logits - lse                                             # (TB, Cp)
    for t in range(T):                                            # static loop
        out_ref[:, t * Cp:(t + 1) * Cp] = lp[t * Bp:(t + 1) * Bp, :]


@functools.partial(jax.jit, static_argnames=("num_tags",))
def _forward_impl(sentence, kparams, *, num_tags):
    table = kparams["embedding"]      # (Vp, Ep) bf16
    w_ih_t = kparams["w_ih_t"]        # (Ep, 4Hp) bf16
    w_hh_t = kparams["w_hh_t"]        # (Hp, 4Hp) bf16
    b_gates = kparams["b_gates"]      # (1, 4Hp) f32
    w_out_t = kparams["w_out_t"]      # (Hp, Cp) bf16
    b_out_p = kparams["b_out_p"]      # (1, Cp) f32

    B, T = sentence.shape
    Hp = w_hh_t.shape[0]
    Cp = w_out_t.shape[1]
    Bp = _round_up(max(B, 8), 8)      # pad batch to a full sublane tile

    # Only remaining wrapper glue: a tiny int32 id reshuffle (time-major).
    ids = jnp.pad(sentence.astype(jnp.int32), ((0, Bp - B), (0, 0)))
    ids_tm = jnp.transpose(ids).reshape(T * Bp, 1)                # row = t*Bp+b

    kernel = functools.partial(_tagger_kernel, T=T, Bp=Bp)
    out2d = pl.pallas_call(
        kernel,
        out_shape=jax.ShapeDtypeStruct((Bp, T * Cp), jnp.float32),
        in_specs=[pl.BlockSpec(memory_space=pltpu.MemorySpace.VMEM)] * 7,
        out_specs=pl.BlockSpec(memory_space=pltpu.MemorySpace.VMEM),
        scratch_shapes=[
            pltpu.VMEM((T * Bp, 4 * Hp), jnp.float32),   # gates_x
            pltpu.VMEM((T * Bp, Hp), jnp.float32),       # all hidden states
        ],
        compiler_params=pltpu.CompilerParams(
            vmem_limit_bytes=32 * 1024 * 1024),
    )(ids_tm, table, w_ih_t, w_hh_t, b_gates, w_out_t, b_out_p)

    # Reshape is layout-free; one slice drops batch/tag padding. No transpose.
    return out2d.reshape(Bp, T, Cp)[:B, :, :num_tags]


def tagger_forward(sentence, params):
    """sentence: (B, T) int32 token ids. Returns (B, T, tagset) log-probs."""
    kparams = {k: v for k, v in params.items() if k != "num_tags"}
    return _forward_impl(sentence, kparams, num_tags=int(params["num_tags"]))


def init_params(key, vocab_size, tagset_size, embedding_dim, hidden_dim):
    """Params stored directly in the kernel layout: pre-transposed, lane-padded
    to 128, biases pre-summed, matmul operands in bf16."""
    ks = jax.random.split(key, 7)
    s = 1.0 / jnp.sqrt(hidden_dim)
    V, C, E, H = vocab_size, tagset_size, embedding_dim, hidden_dim
    emb_table = jax.random.normal(ks[0], (V, E), jnp.float32)
    w_ih = jax.random.uniform(ks[1], (4 * H, E), jnp.float32, -s, s)
    w_hh = jax.random.uniform(ks[2], (4 * H, H), jnp.float32, -s, s)
    b_ih = jax.random.uniform(ks[3], (4 * H,), jnp.float32, -s, s)
    b_hh = jax.random.uniform(ks[4], (4 * H,), jnp.float32, -s, s)
    w_out = jax.random.uniform(ks[5], (C, H), jnp.float32, -s, s)
    b_out = jax.random.uniform(ks[6], (C,), jnp.float32, -s, s)

    Vp = _round_up(max(V, 128), 128)
    Ep = _round_up(max(E, 128), 128)
    Hp = _round_up(max(H, 128), 128)
    Cp = _round_up(max(C, 128), 128)

    table_p = jnp.zeros((Vp, Ep), jnp.float32).at[:V, :E].set(emb_table)

    w_ih_t = jnp.zeros((Ep, 4 * Hp), jnp.float32)
    w_hh_t = jnp.zeros((Hp, 4 * Hp), jnp.float32)
    b_gates = jnp.zeros((1, 4 * Hp), jnp.float32)
    for k in range(4):
        w_ih_t = w_ih_t.at[:E, k * Hp:k * Hp + H].set(
            jnp.transpose(w_ih[k * H:(k + 1) * H, :]))
        w_hh_t = w_hh_t.at[:H, k * Hp:k * Hp + H].set(
            jnp.transpose(w_hh[k * H:(k + 1) * H, :]))
        b_gates = b_gates.at[0, k * Hp:k * Hp + H].set(
            b_ih[k * H:(k + 1) * H] + b_hh[k * H:(k + 1) * H])

    # Lane-dense output: padded logits get a huge negative bias so they add ~0
    # to the softmax denominator (kept in f32; never downcast).
    w_out_t = jnp.zeros((Hp, Cp), jnp.float32).at[:H, :C].set(jnp.transpose(w_out))
    b_out_p = jnp.full((1, Cp), -1e30, jnp.float32).at[0, :C].set(b_out)

    return {
        "embedding": table_p.astype(jnp.bfloat16),
        "w_ih_t": w_ih_t.astype(jnp.bfloat16),
        "w_hh_t": w_hh_t.astype(jnp.bfloat16),
        "b_gates": b_gates,
        "w_out_t": w_out_t.astype(jnp.bfloat16),
        "b_out_p": b_out_p,
        "num_tags": tagset_size,
    }


def tagger_reference(sentence, params):
    """Pure-JAX reference of the same forward (PyTorch LSTM semantics), using
    the same stored (bf16, padded) parameters and h-quantization as the kernel."""
    table = params["embedding"].astype(jnp.float32)
    wih = params["w_ih_t"].astype(jnp.float32)
    whh = params["w_hh_t"].astype(jnp.float32)
    b = params["b_gates"][0]
    wout = params["w_out_t"].astype(jnp.float32)
    bout = params["b_out_p"][0]
    C = int(params["num_tags"])
    Hp = whh.shape[0]

    B, T = sentence.shape
    emb = jnp.take(table, sentence, axis=0)                       # (B, T, Ep)
    h = jnp.zeros((B, Hp), jnp.float32)
    c = jnp.zeros((B, Hp), jnp.float32)
    hs = []
    for t in range(T):
        h_q = h.astype(jnp.bfloat16).astype(jnp.float32)
        g = emb[:, t] @ wih + h_q @ whh + b
        i = _sigmoid(g[:, 0:Hp])
        f = _sigmoid(g[:, Hp:2 * Hp])
        gg = jnp.tanh(g[:, 2 * Hp:3 * Hp])
        o = _sigmoid(g[:, 3 * Hp:4 * Hp])
        c = f * c + i * gg
        h = o * jnp.tanh(c)
        hs.append(h)
    hs = jnp.stack(hs, axis=1)                                    # (B, T, Hp)
    hs_q = hs.astype(jnp.bfloat16).astype(jnp.float32)
    logits = hs_q @ wout + bout
    return jax.nn.log_softmax(logits, axis=-1)[..., :C]


if __name__ == "__main__":
    vocab_size, tagset_size = 50, 8
    embedding_dim, hidden_dim = 32, 32
    batch, seq = 2, 8

    key = jax.random.PRNGKey(0)
    k_params, k_sent = jax.random.split(key)
    params = init_params(k_params, vocab_size, tagset_size,
                         embedding_dim, hidden_dim)
    sentence = jax.random.randint(k_sent, (batch, seq), 0, vocab_size,
                                  dtype=jnp.int32)

    tag_scores = tagger_forward(sentence, params)
    tag_scores = jax.block_until_ready(tag_scores)

    assert tag_scores.shape == (batch, seq, tagset_size)
    # log_softmax sanity: probabilities sum to 1 along the tag dim.
    probs_sum = jnp.sum(jnp.exp(tag_scores), axis=-1)
    assert bool(jnp.all(jnp.isfinite(tag_scores)))
    assert bool(jnp.allclose(probs_sum, 1.0, atol=1e-4))
    # Match the pure-JAX reference (MXU / bf16 rounding tolerance).
    ref = tagger_reference(sentence, params)
    assert bool(jnp.allclose(tag_scores, ref, rtol=0.0, atol=2e-2))

    print("KERNEL_OK")
</pallas_src>

<mosaic_0001>
module attributes {stable_mosaic.version = 11 : i64} {
  func.func @_tagger_kernel(%arg0: memref<64x1xi32, #tpu.memory_space<vmem>>, %arg1: memref<128x128xbf16, #tpu.memory_space<vmem>>, %arg2: memref<128x512xbf16, #tpu.memory_space<vmem>>, %arg3: memref<128x512xbf16, #tpu.memory_space<vmem>>, %arg4: memref<1x512xf32, #tpu.memory_space<vmem>>, %arg5: memref<128x128xbf16, #tpu.memory_space<vmem>>, %arg6: memref<1x128xf32, #tpu.memory_space<vmem>>, %arg7: memref<8x1024xf32, #tpu.memory_space<vmem>>, %arg8: memref<64x512xf32, #tpu.memory_space<vmem>>, %arg9: memref<64x128xf32, #tpu.memory_space<vmem>>) attributes {dimension_semantics = [], scalar_prefetch = 0 : i64, scratch_operands = 2 : i64, tpu.core_type = #tpu.core_type<tc>} {
    %c0 = arith.constant 0 : index
    %c0_0 = arith.constant 0 : index
    %0 = vector.load %arg0[%c0, %c0_0] : memref<64x1xi32, #tpu.memory_space<vmem>>, vector<64x1xi32>
    %1 = tpu.iota {dimensions = array<i32: 1>} : vector<64x128xi32>
    %2 = vector.broadcast %0 : vector<64x1xi32> to vector<64x128xi32>
    %3 = arith.cmpi eq, %2, %1 : vector<64x128xi32>
    %cst = arith.constant 1.000000e+00 : f32
    %cst_1 = arith.constant 0.000000e+00 : f32
    %4 = vector.broadcast %cst : f32 to vector<64x128xf32>
    %5 = vector.broadcast %cst_1 : f32 to vector<64x128xf32>
    %6 = arith.select %3, %4, %5 : vector<64x128xi1>, vector<64x128xf32>
    %7 = arith.truncf %6 : vector<64x128xf32> to vector<64x128xbf16>
    %c0_2 = arith.constant 0 : index
    %c0_3 = arith.constant 0 : index
    %8 = vector.load %arg1[%c0_2, %c0_3] : memref<128x128xbf16, #tpu.memory_space<vmem>>, vector<128x128xbf16>
    %cst_4 = arith.constant dense<0.000000e+00> : vector<64x128xf32>
    %9 = tpu.matmul %7, %8, %cst_4 {dimension_numbers = #tpu.dot_dimension_numbers<[1], [0], [0], [1], [0, 0, 1, 1], [], []>} : vector<64x128xbf16>, vector<128x128xbf16>, vector<64x128xf32> -> vector<64x128xf32>
    %10 = arith.truncf %9 : vector<64x128xf32> to vector<64x128xbf16>
    %c0_5 = arith.constant 0 : index
    %c0_6 = arith.constant 0 : index
    %11 = vector.load %arg2[%c0_5, %c0_6] : memref<128x512xbf16, #tpu.memory_space<vmem>>, vector<128x512xbf16>
    %cst_7 = arith.constant dense<0.000000e+00> : vector<64x512xf32>
    %12 = tpu.matmul %10, %11, %cst_7 {dimension_numbers = #tpu.dot_dimension_numbers<[1], [0], [0], [1], [0, 0, 1, 1], [], []>} : vector<64x128xbf16>, vector<128x512xbf16>, vector<64x512xf32> -> vector<64x512xf32>
    %c0_8 = arith.constant 0 : index
    %c0_9 = arith.constant 0 : index
    %13 = vector.load %arg4[%c0_8, %c0_9] : memref<1x512xf32, #tpu.memory_space<vmem>>, vector<1x512xf32>
    %14 = vector.broadcast %13 : vector<1x512xf32> to vector<64x512xf32>
    %15 = arith.addf %12, %14 : vector<64x512xf32>
    %c0_10 = arith.constant 0 : index
    %c0_11 = arith.constant 0 : index
    %16 = vector.load %arg8[%c0_10, %c0_11] : memref<64x512xf32, #tpu.memory_space<vmem>>, vector<64x512xf32>
    tpu.vector_store %arg8[%c0_10, %c0_11], %15 {strides = array<i32>} : memref<64x512xf32, #tpu.memory_space<vmem>>, vector<64x512xf32>,
    %c0_12 = arith.constant 0 : index
    %c0_13 = arith.constant 0 : index
    %17 = vector.load %arg3[%c0_12, %c0_13] : memref<128x512xbf16, #tpu.memory_space<vmem>>, vector<128x512xbf16>
    %c0_14 = arith.constant 0 : index
    %c0_15 = arith.constant 0 : index
    %18 = vector.load %arg8[%c0_14, %c0_15] : memref<64x512xf32, #tpu.memory_space<vmem>>, vector<8x512xf32>
    %19 = vector.extract_strided_slice %18 {offsets = [0, 0], sizes = [8, 128], strides = [1, 1]} : vector<8x512xf32> to vector<8x128xf32>
    %cst_16 = arith.constant 5.000000e-01 : f32
    %20 = vector.broadcast %cst_16 : f32 to vector<8x128xf32>
    %21 = arith.mulf %20, %19 : vector<8x128xf32>
    %22 = math.tanh %21 : vector<8x128xf32>
    %cst_17 = arith.constant 1.000000e+00 : f32
    %23 = vector.broadcast %cst_17 : f32 to vector<8x128xf32>
    %24 = arith.addf %22, %23 : vector<8x128xf32>
    %cst_18 = arith.constant 5.000000e-01 : f32
    %25 = vector.broadcast %cst_18 : f32 to vector<8x128xf32>
    %26 = arith.mulf %25, %24 : vector<8x128xf32>
    %27 = vector.extract_strided_slice %18 {offsets = [0, 256], sizes = [8, 128], strides = [1, 1]} : vector<8x512xf32> to vector<8x128xf32>
    %28 = math.tanh %27 : vector<8x128xf32>
    %29 = vector.extract_strided_slice %18 {offsets = [0, 384], sizes = [8, 128], strides = [1, 1]} : vector<8x512xf32> to vector<8x128xf32>
    %cst_19 = arith.constant 5.000000e-01 : f32
    %30 = vector.broadcast %cst_19 : f32 to vector<8x128xf32>
    %31 = arith.mulf %30, %29 : vector<8x128xf32>
    %32 = math.tanh %31 : vector<8x128xf32>
    %cst_20 = arith.constant 1.000000e+00 : f32
    %33 = vector.broadcast %cst_20 : f32 to vector<8x128xf32>
    %34 = arith.addf %32, %33 : vector<8x128xf32>
    %cst_21 = arith.constant 5.000000e-01 : f32
    %35 = vector.broadcast %cst_21 : f32 to vector<8x128xf32>
    %36 = arith.mulf %35, %34 : vector<8x128xf32>
    %37 = arith.mulf %26, %28 : vector<8x128xf32>
    %38 = math.tanh %37 : vector<8x128xf32>
    %39 = arith.mulf %36, %38 : vector<8x128xf32>
    %c0_22 = arith.constant 0 : index
    %c0_23 = arith.constant 0 : index
    %40 = vector.load %arg9[%c0_22, %c0_23] : memref<64x128xf32, #tpu.memory_space<vmem>>, vector<8x128xf32>
    tpu.vector_store %arg9[%c0_22, %c0_23], %39 {strides = array<i32>} : memref<64x128xf32, #tpu.memory_space<vmem>>, vector<8x128xf32>,
    %c1_i32 = arith.constant 1 : i32
    %c8_i32 = arith.constant 8 : i32
    %41 = arith.muli %c1_i32, %c8_i32 : i32
    %42 = tpu.assume_multiple %41, 8 : i32
    %43 = arith.index_cast %42 : i32 to index
    %c0_24 = arith.constant 0 : index
    %44 = vector.load %arg8[%43, %c0_24] : memref<64x512xf32, #tpu.memory_space<vmem>>, vector<8x512xf32>
    %45 = arith.truncf %39 : vector<8x128xf32> to vector<8x128xbf16>
    %cst_25 = arith.constant dense<0.000000e+00> : vector<8x512xf32>
    %46 = tpu.matmul %45, %17, %cst_25 {dimension_numbers = #tpu.dot_dimension_numbers<[1], [0], [0], [1], [0, 0, 1, 1], [], []>} : vector<8x128xbf16>, vector<128x512xbf16>, vector<8x512xf32> -> vector<8x512xf32>
    %47 = arith.addf %44, %46 : vector<8x512xf32>
    %48 = vector.extract_strided_slice %47 {offsets = [0, 0], sizes = [8, 128], strides = [1, 1]} : vector<8x512xf32> to vector<8x128xf32>
    %cst_26 = arith.constant 5.000000e-01 : f32
    %49 = vector.broadcast %cst_26 : f32 to vector<8x128xf32>
    %50 = arith.mulf %49, %48 : vector<8x128xf32>
    %51 = math.tanh %50 : vector<8x128xf32>
    %cst_27 = arith.constant 1.000000e+00 : f32
    %52 = vector.broadcast %cst_27 : f32 to vector<8x128xf32>
    %53 = arith.addf %51, %52 : vector<8x128xf32>
    %cst_28 = arith.constant 5.000000e-01 : f32
    %54 = vector.broadcast %cst_28 : f32 to vector<8x128xf32>
    %55 = arith.mulf %54, %53 : vector<8x128xf32>
    %56 = vector.extract_strided_slice %47 {offsets = [0, 128], sizes = [8, 128], strides = [1, 1]} : vector<8x512xf32> to vector<8x128xf32>
    %cst_29 = arith.constant 5.000000e-01 : f32
    %57 = vector.broadcast %cst_29 : f32 to vector<8x128xf32>
    %58 = arith.mulf %57, %56 : vector<8x128xf32>
    %59 = math.tanh %58 : vector<8x128xf32>
    %cst_30 = arith.constant 1.000000e+00 : f32
    %60 = vector.broadcast %cst_30 : f32 to vector<8x128xf32>
    %61 = arith.addf %59, %60 : vector<8x128xf32>
    %cst_31 = arith.constant 5.000000e-01 : f32
    %62 = vector.broadcast %cst_31 : f32 to vector<8x128xf32>
    %63 = arith.mulf %62, %61 : vector<8x128xf32>
    %64 = vector.extract_strided_slice %47 {offsets = [0, 256], sizes = [8, 128], strides = [1, 1]} : vector<8x512xf32> to vector<8x128xf32>
    %65 = math.tanh %64 : vector<8x128xf32>
    %66 = vector.extract_strided_slice %47 {offsets = [0, 384], sizes = [8, 128], strides = [1, 1]} : vector<8x512xf32> to vector<8x128xf32>
    %cst_32 = arith.constant 5.000000e-01 : f32
    %67 = vector.broadcast %cst_32 : f32 to vector<8x128xf32>
    %68 = arith.mulf %67, %66 : vector<8x128xf32>
    %69 = math.tanh %68 : vector<8x128xf32>
    %cst_33 = arith.constant 1.000000e+00 : f32
    %70 = vector.broadcast %cst_33 : f32 to vector<8x128xf32>
    %71 = arith.addf %69, %70 : vector<8x128xf32>
    %cst_34 = arith.constant 5.000000e-01 : f32
    %72 = vector.broadcast %cst_34 : f32 to vector<8x128xf32>
    %73 = arith.mulf %72, %71 : vector<8x128xf32>
    %74 = arith.mulf %63, %37 : vector<8x128xf32>
    %75 = arith.mulf %55, %65 : vector<8x128xf32>
    %76 = arith.addf %74, %75 : vector<8x128xf32>
    %77 = math.tanh %76 : vector<8x128xf32>
    %78 = arith.mulf %73, %77 : vector<8x128xf32>
    %79 = arith.index_cast %42 : i32 to index
    %c0_35 = arith.constant 0 : index
    %80 = vector.load %arg9[%79, %c0_35] : memref<64x128xf32, #tpu.memory_space<vmem>>, vector<8x128xf32>
    tpu.vector_store %arg9[%79, %c0_35], %78 {strides = array<i32>} : memref<64x128xf32, #tpu.memory_space<vmem>>, vector<8x128xf32>,
    %c2_i32 = arith.constant 2 : i32
    %c8_i32_36 = arith.constant 8 : i32
    %81 = arith.muli %c2_i32, %c8_i32_36 : i32
    %82 = tpu.assume_multiple %81, 8 : i32
    %83 = arith.index_cast %82 : i32 to index
    %c0_37 = arith.constant 0 : index
    %84 = vector.load %arg8[%83, %c0_37] : memref<64x512xf32, #tpu.memory_space<vmem>>, vector<8x512xf32>
    %85 = arith.truncf %78 : vector<8x128xf32> to vector<8x128xbf16>
    %cst_38 = arith.constant dense<0.000000e+00> : vector<8x512xf32>
    %86 = tpu.matmul %85, %17, %cst_38 {dimension_numbers = #tpu.dot_dimension_numbers<[1], [0], [0], [1], [0, 0, 1, 1], [], []>} : vector<8x128xbf16>, vector<128x512xbf16>, vector<8x512xf32> -> vector<8x512xf32>
    %87 = arith.addf %84, %86 : vector<8x512xf32>
    %88 = vector.extract_strided_slice %87 {offsets = [0, 0], sizes = [8, 128], strides = [1, 1]} : vector<8x512xf32> to vector<8x128xf32>
    %cst_39 = arith.constant 5.000000e-01 : f32
    %89 = vector.broadcast %cst_39 : f32 to vector<8x128xf32>
    %90 = arith.mulf %89, %88 : vector<8x128xf32>
    %91 = math.tanh %90 : vector<8x128xf32>
    %cst_40 = arith.constant 1.000000e+00 : f32
    %92 = vector.broadcast %cst_40 : f32 to vector<8x128xf32>
    %93 = arith.addf %91, %92 : vector<8x128xf32>
    %cst_41 = arith.constant 5.000000e-01 : f32
    %94 = vector.broadcast %cst_41 : f32 to vector<8x128xf32>
    %95 = arith.mulf %94, %93 : vector<8x128xf32>
    %96 = vector.extract_strided_slice %87 {offsets = [0, 128], sizes = [8, 128], strides = [1, 1]} : vector<8x512xf32> to vector<8x128xf32>
    %cst_42 = arith.constant 5.000000e-01 : f32
    %97 = vector.broadcast %cst_42 : f32 to vector<8x128xf32>
    %98 = arith.mulf %97, %96 : vector<8x128xf32>
    %99 = math.tanh %98 : vector<8x128xf32>
    %cst_43 = arith.constant 1.000000e+00 : f32
    %100 = vector.broadcast %cst_43 : f32 to vector<8x128xf32>
    %101 = arith.addf %99, %100 : vector<8x128xf32>
    %cst_44 = arith.constant 5.000000e-01 : f32
    %102 = vector.broadcast %cst_44 : f32 to vector<8x128xf32>
    %103 = arith.mulf %102, %101 : vector<8x128xf32>
    %104 = vector.extract_strided_slice %87 {offsets = [0, 256], sizes = [8, 128], strides = [1, 1]} : vector<8x512xf32> to vector<8x128xf32>
    %105 = math.tanh %104 : vector<8x128xf32>
    %106 = vector.extract_strided_slice %87 {offsets = [0, 384], sizes = [8, 128], strides = [1, 1]} : vector<8x512xf32> to vector<8x128xf32>
    %cst_45 = arith.constant 5.000000e-01 : f32
    %107 = vector.broadcast %cst_45 : f32 to vector<8x128xf32>
    %108 = arith.mulf %107, %106 : vector<8x128xf32>
    %109 = math.tanh %108 : vector<8x128xf32>
    %cst_46 = arith.constant 1.000000e+00 : f32
    %110 = vector.broadcast %cst_46 : f32 to vector<8x128xf32>
    %111 = arith.addf %109, %110 : vector<8x128xf32>
    %cst_47 = arith.constant 5.000000e-01 : f32
    %112 = vector.broadcast %cst_47 : f32 to vector<8x128xf32>
    %113 = arith.mulf %112, %111 : vector<8x128xf32>
    %114 = arith.mulf %103, %76 : vector<8x128xf32>
    %115 = arith.mulf %95, %105 : vector<8x128xf32>
    %116 = arith.addf %114, %115 : vector<8x128xf32>
    %117 = math.tanh %116 : vector<8x128xf32>
    %118 = arith.mulf %113, %117 : vector<8x128xf32>
    %119 = arith.index_cast %82 : i32 to index
    %c0_48 = arith.constant 0 : index
    %120 = vector.load %arg9[%119, %c0_48] : memref<64x128xf32, #tpu.memory_space<vmem>>, vector<8x128xf32>
    tpu.vector_store %arg9[%119, %c0_48], %118 {strides = array<i32>} : memref<64x128xf32, #tpu.memory_space<vmem>>, vector<8x128xf32>,
    %c3_i32 = arith.constant 3 : i32
    %c8_i32_49 = arith.constant 8 : i32
    %121 = arith.muli %c3_i32, %c8_i32_49 : i32
    %122 = tpu.assume_multiple %121, 8 : i32
    %123 = arith.index_cast %122 : i32 to index
    %c0_50 = arith.constant 0 : index
    %124 = vector.load %arg8[%123, %c0_50] : memref<64x512xf32, #tpu.memory_space<vmem>>, vector<8x512xf32>
    %125 = arith.truncf %118 : vector<8x128xf32> to vector<8x128xbf16>
    %cst_51 = arith.constant dense<0.000000e+00> : vector<8x512xf32>
    %126 = tpu.matmul %125, %17, %cst_51 {dimension_numbers = #tpu.dot_dimension_numbers<[1], [0], [0], [1], [0, 0, 1, 1], [], []>} : vector<8x128xbf16>, vector<128x512xbf16>, vector<8x512xf32> -> vector<8x512xf32>
    %127 = arith.addf %124, %126 : vector<8x512xf32>
    %128 = vector.extract_strided_slice %127 {offsets = [0, 0], sizes = [8, 128], strides = [1, 1]} : vector<8x512xf32> to vector<8x128xf32>
    %cst_52 = arith.constant 5.000000e-01 : f32
    %129 = vector.broadcast %cst_52 : f32 to vector<8x128xf32>
    %130 = arith.mulf %129, %128 : vector<8x128xf32>
    %131 = math.tanh %130 : vector<8x128xf32>
    %cst_53 = arith.constant 1.000000e+00 : f32
    %132 = vector.broadcast %cst_53 : f32 to vector<8x128xf32>
    %133 = arith.addf %131, %132 : vector<8x128xf32>
    %cst_54 = arith.constant 5.000000e-01 : f32
    %134 = vector.broadcast %cst_54 : f32 to vector<8x128xf32>
    %135 = arith.mulf %134, %133 : vector<8x128xf32>
    %136 = vector.extract_strided_slice %127 {offsets = [0, 128], sizes = [8, 128], strides = [1, 1]} : vector<8x512xf32> to vector<8x128xf32>
    %cst_55 = arith.constant 5.000000e-01 : f32
    %137 = vector.broadcast %cst_55 : f32 to vector<8x128xf32>
    %138 = arith.mulf %137, %136 : vector<8x128xf32>
    %139 = math.tanh %138 : vector<8x128xf32>
    %cst_56 = arith.constant 1.000000e+00 : f32
    %140 = vector.broadcast %cst_56 : f32 to vector<8x128xf32>
    %141 = arith.addf %139, %140 : vector<8x128xf32>
    %cst_57 = arith.constant 5.000000e-01 : f32
    %142 = vector.broadcast %cst_57 : f32 to vector<8x128xf32>
    %143 = arith.mulf %142, %141 : vector<8x128xf32>
    %144 = vector.extract_strided_slice %127 {offsets = [0, 256], sizes = [8, 128], strides = [1, 1]} : vector<8x512xf32> to vector<8x128xf32>
    %145 = math.tanh %144 : vector<8x128xf32>
    %146 = vector.extract_strided_slice %127 {offsets = [0, 384], sizes = [8, 128], strides = [1, 1]} : vector<8x512xf32> to vector<8x128xf32>
    %cst_58 = arith.constant 5.000000e-01 : f32
    %147 = vector.broadcast %cst_58 : f32 to vector<8x128xf32>
    %148 = arith.mulf %147, %146 : vector<8x128xf32>
    %149 = math.tanh %148 : vector<8x128xf32>
    %cst_59 = arith.constant 1.000000e+00 : f32
    %150 = vector.broadcast %cst_59 : f32 to vector<8x128xf32>
    %151 = arith.addf %149, %150 : vector<8x128xf32>
    %cst_60 = arith.constant 5.000000e-01 : f32
    %152 = vector.broadcast %cst_60 : f32 to vector<8x128xf32>
    %153 = arith.mulf %152, %151 : vector<8x128xf32>
    %154 = arith.mulf %143, %116 : vector<8x128xf32>
    %155 = arith.mulf %135, %145 : vector<8x128xf32>
    %156 = arith.addf %154, %155 : vector<8x128xf32>
    %157 = math.tanh %156 : vector<8x128xf32>
    %158 = arith.mulf %153, %157 : vector<8x128xf32>
    %159 = arith.index_cast %122 : i32 to index
    %c0_61 = arith.constant 0 : index
    %160 = vector.load %arg9[%159, %c0_61] : memref<64x128xf32, #tpu.memory_space<vmem>>, vector<8x128xf32>
    tpu.vector_store %arg9[%159, %c0_61], %158 {strides = array<i32>} : memref<64x128xf32, #tpu.memory_space<vmem>>, vector<8x128xf32>,
    %c4_i32 = arith.constant 4 : i32
    %c8_i32_62 = arith.constant 8 : i32
    %161 = arith.muli %c4_i32, %c8_i32_62 : i32
    %162 = tpu.assume_multiple %161, 8 : i32
    %163 = arith.index_cast %162 : i32 to index
    %c0_63 = arith.constant 0 : index
    %164 = vector.load %arg8[%163, %c0_63] : memref<64x512xf32, #tpu.memory_space<vmem>>, vector<8x512xf32>
    %165 = arith.truncf %158 : vector<8x128xf32> to vector<8x128xbf16>
    %cst_64 = arith.constant dense<0.000000e+00> : vector<8x512xf32>
    %166 = tpu.matmul %165, %17, %cst_64 {dimension_numbers = #tpu.dot_dimension_numbers<[1], [0], [0], [1], [0, 0, 1, 1], [], []>} : vector<8x128xbf16>, vector<128x512xbf16>, vector<8x512xf32> -> vector<8x512xf32>
    %167 = arith.addf %164, %166 : vector<8x512xf32>
    %168 = vector.extract_strided_slice %167 {offsets = [0, 0], sizes = [8, 128], strides = [1, 1]} : vector<8x512xf32> to vector<8x128xf32>
    %cst_65 = arith.constant 5.000000e-01 : f32
    %169 = vector.broadcast %cst_65 : f32 to vector<8x128xf32>
    %170 = arith.mulf %169, %168 : vector<8x128xf32>
    %171 = math.tanh %170 : vector<8x128xf32>
    %cst_66 = arith.constant 1.000000e+00 : f32
    %172 = vector.broadcast %cst_66 : f32 to vector<8x128xf32>
    %173 = arith.addf %171, %172 : vector<8x128xf32>
    %cst_67 = arith.constant 5.000000e-01 : f32
    %174 = vector.broadcast %cst_67 : f32 to vector<8x128xf32>
    %175 = arith.mulf %174, %173 : vector<8x128xf32>
    %176 = vector.extract_strided_slice %167 {offsets = [0, 128], sizes = [8, 128], strides = [1, 1]} : vector<8x512xf32> to vector<8x128xf32>
    %cst_68 = arith.constant 5.000000e-01 : f32
    %177 = vector.broadcast %cst_68 : f32 to vector<8x128xf32>
    %178 = arith.mulf %177, %176 : vector<8x128xf32>
    %179 = math.tanh %178 : vector<8x128xf32>
    %cst_69 = arith.constant 1.000000e+00 : f32
    %180 = vector.broadcast %cst_69 : f32 to vector<8x128xf32>
    %181 = arith.addf %179, %180 : vector<8x128xf32>
    %cst_70 = arith.constant 5.000000e-01 : f32
    %182 = vector.broadcast %cst_70 : f32 to vector<8x128xf32>
    %183 = arith.mulf %182, %181 : vector<8x128xf32>
    %184 = vector.extract_strided_slice %167 {offsets = [0, 256], sizes = [8, 128], strides = [1, 1]} : vector<8x512xf32> to vector<8x128xf32>
    %185 = math.tanh %184 : vector<8x128xf32>
    %186 = vector.extract_strided_slice %167 {offsets = [0, 384], sizes = [8, 128], strides = [1, 1]} : vector<8x512xf32> to vector<8x128xf32>
    %cst_71 = arith.constant 5.000000e-01 : f32
    %187 = vector.broadcast %cst_71 : f32 to vector<8x128xf32>
    %188 = arith.mulf %187, %186 : vector<8x128xf32>
    %189 = math.tanh %188 : vector<8x128xf32>
    %cst_72 = arith.constant 1.000000e+00 : f32
    %190 = vector.broadcast %cst_72 : f32 to vector<8x128xf32>
    %191 = arith.addf %189, %190 : vector<8x128xf32>
    %cst_73 = arith.constant 5.000000e-01 : f32
    %192 = vector.broadcast %cst_73 : f32 to vector<8x128xf32>
    %193 = arith.mulf %192, %191 : vector<8x128xf32>
    %194 = arith.mulf %183, %156 : vector<8x128xf32>
    %195 = arith.mulf %175, %185 : vector<8x128xf32>
    %196 = arith.addf %194, %195 : vector<8x128xf32>
    %197 = math.tanh %196 : vector<8x128xf32>
    %198 = arith.mulf %193, %197 : vector<8x128xf32>
    %199 = arith.index_cast %162 : i32 to index
    %c0_74 = arith.constant 0 : index
    %200 = vector.load %arg9[%199, %c0_74] : memref<64x128xf32, #tpu.memory_space<vmem>>, vector<8x128xf32>
    tpu.vector_store %arg9[%199, %c0_74], %198 {strides = array<i32>} : memref<64x128xf32, #tpu.memory_space<vmem>>, vector<8x128xf32>,
    %c5_i32 = arith.constant 5 : i32
    %c8_i32_75 = arith.constant 8 : i32
    %201 = arith.muli %c5_i32, %c8_i32_75 : i32
    %202 = tpu.assume_multiple %201, 8 : i32
    %203 = arith.index_cast %202 : i32 to index
    %c0_76 = arith.constant 0 : index
    %204 = vector.load %arg8[%203, %c0_76] : memref<64x512xf32, #tpu.memory_space<vmem>>, vector<8x512xf32>
    %205 = arith.truncf %198 : vector<8x128xf32> to vector<8x128xbf16>
    %cst_77 = arith.constant dense<0.000000e+00> : vector<8x512xf32>
    %206 = tpu.matmul %205, %17, %cst_77 {dimension_numbers = #tpu.dot_dimension_numbers<[1], [0], [0], [1], [0, 0, 1, 1], [], []>} : vector<8x128xbf16>, vector<128x512xbf16>, vector<8x512xf32> -> vector<8x512xf32>
    %207 = arith.addf %204, %206 : vector<8x512xf32>
    %208 = vector.extract_strided_slice %207 {offsets = [0, 0], sizes = [8, 128], strides = [1, 1]} : vector<8x512xf32> to vector<8x128xf32>
    %cst_78 = arith.constant 5.000000e-01 : f32
    %209 = vector.broadcast %cst_78 : f32 to vector<8x128xf32>
    %210 = arith.mulf %209, %208 : vector<8x128xf32>
    %211 = math.tanh %210 : vector<8x128xf32>
    %cst_79 = arith.constant 1.000000e+00 : f32
    %212 = vector.broadcast %cst_79 : f32 to vector<8x128xf32>
    %213 = arith.addf %211, %212 : vector<8x128xf32>
    %cst_80 = arith.constant 5.000000e-01 : f32
    %214 = vector.broadcast %cst_80 : f32 to vector<8x128xf32>
    %215 = arith.mulf %214, %213 : vector<8x128xf32>
    %216 = vector.extract_strided_slice %207 {offsets = [0, 128], sizes = [8, 128], strides = [1, 1]} : vector<8x512xf32> to vector<8x128xf32>
    %cst_81 = arith.constant 5.000000e-01 : f32
    %217 = vector.broadcast %cst_81 : f32 to vector<8x128xf32>
    %218 = arith.mulf %217, %216 : vector<8x128xf32>
    %219 = math.tanh %218 : vector<8x128xf32>
    %cst_82 = arith.constant 1.000000e+00 : f32
    %220 = vector.broadcast %cst_82 : f32 to vector<8x128xf32>
    %221 = arith.addf %219, %220 : vector<8x128xf32>
    %cst_83 = arith.constant 5.000000e-01 : f32
    %222 = vector.broadcast %cst_83 : f32 to vector<8x128xf32>
    %223 = arith.mulf %222, %221 : vector<8x128xf32>
    %224 = vector.extract_strided_slice %207 {offsets = [0, 256], sizes = [8, 128], strides = [1, 1]} : vector<8x512xf32> to vector<8x128xf32>
    %225 = math.tanh %224 : vector<8x128xf32>
    %226 = vector.extract_strided_slice %207 {offsets = [0, 384], sizes = [8, 128], strides = [1, 1]} : vector<8x512xf32> to vector<8x128xf32>
    %cst_84 = arith.constant 5.000000e-01 : f32
    %227 = vector.broadcast %cst_84 : f32 to vector<8x128xf32>
    %228 = arith.mulf %227, %226 : vector<8x128xf32>
    %229 = math.tanh %228 : vector<8x128xf32>
    %cst_85 = arith.constant 1.000000e+00 : f32
    %230 = vector.broadcast %cst_85 : f32 to vector<8x128xf32>
    %231 = arith.addf %229, %230 : vector<8x128xf32>
    %cst_86 = arith.constant 5.000000e-01 : f32
    %232 = vector.broadcast %cst_86 : f32 to vector<8x128xf32>
    %233 = arith.mulf %232, %231 : vector<8x128xf32>
    %234 = arith.mulf %223, %196 : vector<8x128xf32>
    %235 = arith.mulf %215, %225 : vector<8x128xf32>
    %236 = arith.addf %234, %235 : vector<8x128xf32>
    %237 = math.tanh %236 : vector<8x128xf32>
    %238 = arith.mulf %233, %237 : vector<8x128xf32>
    %239 = arith.index_cast %202 : i32 to index
    %c0_87 = arith.constant 0 : index
    %240 = vector.load %arg9[%239, %c0_87] : memref<64x128xf32, #tpu.memory_space<vmem>>, vector<8x128xf32>
    tpu.vector_store %arg9[%239, %c0_87], %238 {strides = array<i32>} : memref<64x128xf32, #tpu.memory_space<vmem>>, vector<8x128xf32>,
    %c6_i32 = arith.constant 6 : i32
    %c8_i32_88 = arith.constant 8 : i32
    %241 = arith.muli %c6_i32, %c8_i32_88 : i32
    %242 = tpu.assume_multiple %241, 8 : i32
    %243 = arith.index_cast %242 : i32 to index
    %c0_89 = arith.constant 0 : index
    %244 = vector.load %arg8[%243, %c0_89] : memref<64x512xf32, #tpu.memory_space<vmem>>, vector<8x512xf32>
    %245 = arith.truncf %238 : vector<8x128xf32> to vector<8x128xbf16>
    %cst_90 = arith.constant dense<0.000000e+00> : vector<8x512xf32>
    %246 = tpu.matmul %245, %17, %cst_90 {dimension_numbers = #tpu.dot_dimension_numbers<[1], [0], [0], [1], [0, 0, 1, 1], [], []>} : vector<8x128xbf16>, vector<128x512xbf16>, vector<8x512xf32> -> vector<8x512xf32>
    %247 = arith.addf %244, %246 : vector<8x512xf32>
    %248 = vector.extract_strided_slice %247 {offsets = [0, 0], sizes = [8, 128], strides = [1, 1]} : vector<8x512xf32> to vector<8x128xf32>
    %cst_91 = arith.constant 5.000000e-01 : f32
    %249 = vector.broadcast %cst_91 : f32 to vector<8x128xf32>
    %250 = arith.mulf %249, %248 : vector<8x128xf32>
    %251 = math.tanh %250 : vector<8x128xf32>
    %cst_92 = arith.constant 1.000000e+00 : f32
    %252 = vector.broadcast %cst_92 : f32 to vector<8x128xf32>
    %253 = arith.addf %251, %252 : vector<8x128xf32>
    %cst_93 = arith.constant 5.000000e-01 : f32
    %254 = vector.broadcast %cst_93 : f32 to vector<8x128xf32>
    %255 = arith.mulf %254, %253 : vector<8x128xf32>
    %256 = vector.extract_strided_slice %247 {offsets = [0, 128], sizes = [8, 128], strides = [1, 1]} : vector<8x512xf32> to vector<8x128xf32>
    %cst_94 = arith.constant 5.000000e-01 : f32
    %257 = vector.broadcast %cst_94 : f32 to vector<8x128xf32>
    %258 = arith.mulf %257, %256 : vector<8x128xf32>
    %259 = math.tanh %258 : vector<8x128xf32>
    %cst_95 = arith.constant 1.000000e+00 : f32
    %260 = vector.broadcast %cst_95 : f32 to vector<8x128xf32>
    %261 = arith.addf %259, %260 : vector<8x128xf32>
    %cst_96 = arith.constant 5.000000e-01 : f32
    %262 = vector.broadcast %cst_96 : f32 to vector<8x128xf32>
    %263 = arith.mulf %262, %261 : vector<8x128xf32>
    %264 = vector.extract_strided_slice %247 {offsets = [0, 256], sizes = [8, 128], strides = [1, 1]} : vector<8x512xf32> to vector<8x128xf32>
    %265 = math.tanh %264 : vector<8x128xf32>
    %266 = vector.extract_strided_slice %247 {offsets = [0, 384], sizes = [8, 128], strides = [1, 1]} : vector<8x512xf32> to vector<8x128xf32>
    %cst_97 = arith.constant 5.000000e-01 : f32
    %267 = vector.broadcast %cst_97 : f32 to vector<8x128xf32>
    %268 = arith.mulf %267, %266 : vector<8x128xf32>
    %269 = math.tanh %268 : vector<8x128xf32>
    %cst_98 = arith.constant 1.000000e+00 : f32
    %270 = vector.broadcast %cst_98 : f32 to vector<8x128xf32>
    %271 = arith.addf %269, %270 : vector<8x128xf32>
    %cst_99 = arith.constant 5.000000e-01 : f32
    %272 = vector.broadcast %cst_99 : f32 to vector<8x128xf32>
    %273 = arith.mulf %272, %271 : vector<8x128xf32>
    %274 = arith.mulf %263, %236 : vector<8x128xf32>
    %275 = arith.mulf %255, %265 : vector<8x128xf32>
    %276 = arith.addf %274, %275 : vector<8x128xf32>
    %277 = math.tanh %276 : vector<8x128xf32>
    %278 = arith.mulf %273, %277 : vector<8x128xf32>
    %279 = arith.index_cast %242 : i32 to index
    %c0_100 = arith.constant 0 : index
    %280 = vector.load %arg9[%279, %c0_100] : memref<64x128xf32, #tpu.memory_space<vmem>>, vector<8x128xf32>
    tpu.vector_store %arg9[%279, %c0_100], %278 {strides = array<i32>} : memref<64x128xf32, #tpu.memory_space<vmem>>, vector<8x128xf32>,
    %c7_i32 = arith.constant 7 : i32
    %c8_i32_101 = arith.constant 8 : i32
    %281 = arith.muli %c7_i32, %c8_i32_101 : i32
    %282 = tpu.assume_multiple %281, 8 : i32
    %283 = arith.index_cast %282 : i32 to index
    %c0_102 = arith.constant 0 : index
    %284 = vector.load %arg8[%283, %c0_102] : memref<64x512xf32, #tpu.memory_space<vmem>>, vector<8x512xf32>
    %285 = arith.truncf %278 : vector<8x128xf32> to vector<8x128xbf16>
    %cst_103 = arith.constant dense<0.000000e+00> : vector<8x512xf32>
    %286 = tpu.matmul %285, %17, %cst_103 {dimension_numbers = #tpu.dot_dimension_numbers<[1], [0], [0], [1], [0, 0, 1, 1], [], []>} : vector<8x128xbf16>, vector<128x512xbf16>, vector<8x512xf32> -> vector<8x512xf32>
    %287 = arith.addf %284, %286 : vector<8x512xf32>
    %288 = vector.extract_strided_slice %287 {offsets = [0, 0], sizes = [8, 128], strides = [1, 1]} : vector<8x512xf32> to vector<8x128xf32>
    %cst_104 = arith.constant 5.000000e-01 : f32
    %289 = vector.broadcast %cst_104 : f32 to vector<8x128xf32>
    %290 = arith.mulf %289, %288 : vector<8x128xf32>
    %291 = math.tanh %290 : vector<8x128xf32>
    %cst_105 = arith.constant 1.000000e+00 : f32
    %292 = vector.broadcast %cst_105 : f32 to vector<8x128xf32>
    %293 = arith.addf %291, %292 : vector<8x128xf32>
    %cst_106 = arith.constant 5.000000e-01 : f32
    %294 = vector.broadcast %cst_106 : f32 to vector<8x128xf32>
    %295 = arith.mulf %294, %293 : vector<8x128xf32>
    %296 = vector.extract_strided_slice %287 {offsets = [0, 128], sizes = [8, 128], strides = [1, 1]} : vector<8x512xf32> to vector<8x128xf32>
    %cst_107 = arith.constant 5.000000e-01 : f32
    %297 = vector.broadcast %cst_107 : f32 to vector<8x128xf32>
    %298 = arith.mulf %297, %296 : vector<8x128xf32>
    %299 = math.tanh %298 : vector<8x128xf32>
    %cst_108 = arith.constant 1.000000e+00 : f32
    %300 = vector.broadcast %cst_108 : f32 to vector<8x128xf32>
    %301 = arith.addf %299, %300 : vector<8x128xf32>
    %cst_109 = arith.constant 5.000000e-01 : f32
    %302 = vector.broadcast %cst_109 : f32 to vector<8x128xf32>
    %303 = arith.mulf %302, %301 : vector<8x128xf32>
    %304 = vector.extract_strided_slice %287 {offsets = [0, 256], sizes = [8, 128], strides = [1, 1]} : vector<8x512xf32> to vector<8x128xf32>
    %305 = math.tanh %304 : vector<8x128xf32>
    %306 = vector.extract_strided_slice %287 {offsets = [0, 384], sizes = [8, 128], strides = [1, 1]} : vector<8x512xf32> to vector<8x128xf32>
    %cst_110 = arith.constant 5.000000e-01 : f32
    %307 = vector.broadcast %cst_110 : f32 to vector<8x128xf32>
    %308 = arith.mulf %307, %306 : vector<8x128xf32>
    %309 = math.tanh %308 : vector<8x128xf32>
    %cst_111 = arith.constant 1.000000e+00 : f32
    %310 = vector.broadcast %cst_111 : f32 to vector<8x128xf32>
    %311 = arith.addf %309, %310 : vector<8x128xf32>
    %cst_112 = arith.constant 5.000000e-01 : f32
    %312 = vector.broadcast %cst_112 : f32 to vector<8x128xf32>
    %313 = arith.mulf %312, %311 : vector<8x128xf32>
    %314 = arith.mulf %303, %276 : vector<8x128xf32>
    %315 = arith.mulf %295, %305 : vector<8x128xf32>
    %316 = arith.addf %314, %315 : vector<8x128xf32>
    %317 = math.tanh %316 : vector<8x128xf32>
    %318 = arith.mulf %313, %317 : vector<8x128xf32>
    %319 = arith.index_cast %282 : i32 to index
    %c0_113 = arith.constant 0 : index
    %320 = vector.load %arg9[%319, %c0_113] : memref<64x128xf32, #tpu.memory_space<vmem>>, vector<8x128xf32>
    tpu.vector_store %arg9[%319, %c0_113], %318 {strides = array<i32>} : memref<64x128xf32, #tpu.memory_space<vmem>>, vector<8x128xf32>,
    %c7_i32_114 = arith.constant 7 : i32
    %c0_115 = arith.constant 0 : index
    %c0_116 = arith.constant 0 : index
    %321 = vector.load %arg9[%c0_115, %c0_116] : memref<64x128xf32, #tpu.memory_space<vmem>>, vector<64x128xf32>
    %322 = arith.truncf %321 : vector<64x128xf32> to vector<64x128xbf16>
    %c0_117 = arith.constant 0 : index
    %c0_118 = arith.constant 0 : index
    %323 = vector.load %arg5[%c0_117, %c0_118] : memref<128x128xbf16, #tpu.memory_space<vmem>>, vector<128x128xbf16>
    %cst_119 = arith.constant dense<0.000000e+00> : vector<64x128xf32>
    %324 = tpu.matmul %322, %323, %cst_119 {dimension_numbers = #tpu.dot_dimension_numbers<[1], [0], [0], [1], [0, 0, 1, 1], [], []>} : vector<64x128xbf16>, vector<128x128xbf16>, vector<64x128xf32> -> vector<64x128xf32>
    %c0_120 = arith.constant 0 : index
    %c0_121 = arith.constant 0 : index
    %325 = vector.load %arg6[%c0_120, %c0_121] : memref<1x128xf32, #tpu.memory_space<vmem>>, vector<1x128xf32>
    %326 = vector.broadcast %325 : vector<1x128xf32> to vector<64x128xf32>
    %327 = arith.addf %324, %326 : vector<64x128xf32>
    %cst_122 = arith.constant dense<0xFF800000> : vector<64xf32>
    %328 = vector.multi_reduction <maximumf>, %327, %cst_122 [1] : vector<64x128xf32> to vector<64xf32>
    %329 = vector.shape_cast %328 : vector<64xf32> to vector<64x1xf32>
    %330 = vector.broadcast %329 : vector<64x1xf32> to vector<64x128xf32>
    %331 = arith.subf %327, %330 : vector<64x128xf32>
    %332 = math.exp %331 : vector<64x128xf32>
    %cst_123 = arith.constant dense<0.000000e+00> : vector<64xf32>
    %333 = vector.multi_reduction <add>, %332, %cst_123 [1] : vector<64x128xf32> to vector<64xf32>
    %334 = vector.shape_cast %333 : vector<64xf32> to vector<64x1xf32>
    %335 = math.log %334 : vector<64x1xf32>
    %336 = arith.addf %329, %335 : vector<64x1xf32>
    %337 = vector.broadcast %336 : vector<64x1xf32> to vector<64x128xf32>
    %338 = arith.subf %327, %337 : vector<64x128xf32>
    %339 = vector.extract_strided_slice %338 {offsets = [0, 0], sizes = [8, 128], strides = [1, 1]} : vector<64x128xf32> to vector<8x128xf32>
    %c0_124 = arith.constant 0 : index
    %c0_125 = arith.constant 0 : index
    %340 = vector.load %arg7[%c0_124, %c0_125] : memref<8x1024xf32, #tpu.memory_space<vmem>>, vector<8x128xf32>
    tpu.vector_store %arg7[%c0_124, %c0_125], %339 {strides = array<i32>} : memref<8x1024xf32, #tpu.memory_space<vmem>>, vector<8x128xf32>,
    %341 = vector.extract_strided_slice %338 {offsets = [8, 0], sizes = [8, 128], strides = [1, 1]} : vector<64x128xf32> to vector<8x128xf32>
    %c0_126 = arith.constant 0 : index
    %c128 = arith.constant 128 : index
    %342 = vector.load %arg7[%c0_126, %c128] : memref<8x1024xf32, #tpu.memory_space<vmem>>, vector<8x128xf32>
    tpu.vector_store %arg7[%c0_126, %c128], %341 {strides = array<i32>} : memref<8x1024xf32, #tpu.memory_space<vmem>>, vector<8x128xf32>,
    %343 = vector.extract_strided_slice %338 {offsets = [16, 0], sizes = [8, 128], strides = [1, 1]} : vector<64x128xf32> to vector<8x128xf32>
    %c0_127 = arith.constant 0 : index
    %c256 = arith.constant 256 : index
    %344 = vector.load %arg7[%c0_127, %c256] : memref<8x1024xf32, #tpu.memory_space<vmem>>, vector<8x128xf32>
    tpu.vector_store %arg7[%c0_127, %c256], %343 {strides = array<i32>} : memref<8x1024xf32, #tpu.memory_space<vmem>>, vector<8x128xf32>,
    %345 = vector.extract_strided_slice %338 {offsets = [24, 0], sizes = [8, 128], strides = [1, 1]} : vector<64x128xf32> to vector<8x128xf32>
    %c0_128 = arith.constant 0 : index
    %c384 = arith.constant 384 : index
    %346 = vector.load %arg7[%c0_128, %c384] : memref<8x1024xf32, #tpu.memory_space<vmem>>, vector<8x128xf32>
    tpu.vector_store %arg7[%c0_128, %c384], %345 {strides = array<i32>} : memref<8x1024xf32, #tpu.memory_space<vmem>>, vector<8x128xf32>,
    %347 = vector.extract_strided_slice %338 {offsets = [32, 0], sizes = [8, 128], strides = [1, 1]} : vector<64x128xf32> to vector<8x128xf32>
    %c0_129 = arith.constant 0 : index
    %c512 = arith.constant 512 : index
    %348 = vector.load %arg7[%c0_129, %c512] : memref<8x1024xf32, #tpu.memory_space<vmem>>, vector<8x128xf32>
    tpu.vector_store %arg7[%c0_129, %c512], %347 {strides = array<i32>} : memref<8x1024xf32, #tpu.memory_space<vmem>>, vector<8x128xf32>,
    %349 = vector.extract_strided_slice %338 {offsets = [40, 0], sizes = [8, 128], strides = [1, 1]} : vector<64x128xf32> to vector<8x128xf32>
    %c0_130 = arith.constant 0 : index
    %c640 = arith.constant 640 : index
    %350 = vector.load %arg7[%c0_130, %c640] : memref<8x1024xf32, #tpu.memory_space<vmem>>, vector<8x128xf32>
    tpu.vector_store %arg7[%c0_130, %c640], %349 {strides = array<i32>} : memref<8x1024xf32, #tpu.memory_space<vmem>>, vector<8x128xf32>,
    %351 = vector.extract_strided_slice %338 {offsets = [48, 0], sizes = [8, 128], strides = [1, 1]} : vector<64x128xf32> to vector<8x128xf32>
    %c0_131 = arith.constant 0 : index
    %c768 = arith.constant 768 : index
    %352 = vector.load %arg7[%c0_131, %c768] : memref<8x1024xf32, #tpu.memory_space<vmem>>, vector<8x128xf32>
    tpu.vector_store %arg7[%c0_131, %c768], %351 {strides = array<i32>} : memref<8x1024xf32, #tpu.memory_space<vmem>>, vector<8x128xf32>,
    %353 = vector.extract_strided_slice %338 {offsets = [56, 0], sizes = [8, 128], strides = [1, 1]} : vector<64x128xf32> to vector<8x128xf32>
    %c0_132 = arith.constant 0 : index
    %c896 = arith.constant 896 : index
    %354 = vector.load %arg7[%c0_132, %c896] : memref<8x1024xf32, #tpu.memory_space<vmem>>, vector<8x128xf32>
    tpu.vector_store %arg7[%c0_132, %c896], %353 {strides = array<i32>} : memref<8x1024xf32, #tpu.memory_space<vmem>>, vector<8x128xf32>,
    return
  }
}

</mosaic_0001>

<bundles_post_ra>
// kernel: _forward_impl.1
= control target key start
LH: loop header
LB: loop body
LE: loop exit
PB: predicated region body
PF: predicated region fallthrough
CT: control target
= control target key end

     0   :  { %12 = vsyncpa [#allocation5], 0  ;;  %s3116_s0 = inlined_call_operand.vmem [shape: s32[64,1], index: 0, kind: input, shape index: {}]   ;;  %s3117_s1 = inlined_call_operand.vmem [shape: bf16[128,128], index: 1, kind: input, shape index: {}]   ;;  %s3118_s2 = inlined_call_operand.hbm [shape: bf16[128,512], index: 2, kind: input, shape index: {}]   ;;  %s3119_s3 = inlined_call_operand.hbm [shape: bf16[128,512], index: 3, kind: input, shape index: {}]   ;;  %s3120_s4 = inlined_call_operand.vmem [shape: f32[1,512], index: 4, kind: input, shape index: {}]   ;;  %s3121_s5 = inlined_call_operand.hbm [shape: bf16[128,128], index: 5, kind: input, shape index: {}]   ;;  %s3122_s6 = inlined_call_operand.vmem [shape: f32[1,128], index: 6, kind: input, shape index: {}]   ;;  %s3123_s7 = inlined_call_operand.vmem [shape: f32[8,1024], index: 7, kind: output, shape index: {}]  }
   0x1   :  { %13 = vsyncpa [#allocation7], 0  ;;  %s2380_s24 = smov [#allocation6]   ;;  %s2381_s26 = smov [#allocation4]  }
   0x2   :  { %s35_s25 = sshll.u32 %s2380_s24, 4  ;;  %s23_s27 = sshll.u32 %s2381_s26, 4  ;;  %s36_s25 = int_to_ptr.vmem [resolvable:$true] %s35_s25  ;;  %s2429_s27 = int_to_ptr.vmem [resolvable:$true] %s23_s27 }
   0x3   :  { %s2310_s30 = scalar_lea.hbm %s3119_s3, 4096 }
   0x4   :  { %p2311_p0 = scmp.ne.s32.totalorder %s3119_s3, %s2310_s30  ;;  %p2314_p1 = scmp.lt.u32.totalorder %s2310_s30, %s3119_s3 }
   0x6   :  { %p2316_p2 = pnand %p2314_p1, %p2311_p0 }
   0x8   :  { %2319 = shalt.err (!%p2316_p2)
}
   0x9   :  { %s2320_s12 = scalar_lea.vmem %s36_s25, 4096  ;;  %p2325_p4 = scmp.lt.s32.totalorder %s36_s25, %s36_s25 }
   0xa   :  { %p2321_p3 = scmp.ne.s32.totalorder %s36_s25, %s2320_s12  ;;  %p2326_p5 = scmp.lt.s32.totalorder %s2320_s12, %s2320_s12 }
   0xc   :  { %p2327_p6 = por %p2326_p5, %p2325_p4 }
   0xe   :  { %p2328_p7 = pnand %p2327_p6, %p2321_p3 }
  0x10   :  { %2331 = shalt.err (!%p2328_p7)
}
  0x11   :  { %s2382_s13 = smov 256   ;;  %s2383_s14 = smov 16  }
  0x12   :  { %41 = dma.hbm_to_vmem [thread:$0]  %s3119_s3, 4096, %s36_s25, [#allocation7], %s2382_s13, %s2382_s13, %s2383_s14  }
  0x13   :  { %s2332_s19 = scalar_lea.hbm %s3118_s2, 4096 }
  0x14   :  { %p2333_p8 = scmp.ne.s32.totalorder %s3118_s2, %s2332_s19  ;;  %p2336_p9 = scmp.lt.u32.totalorder %s2332_s19, %s3118_s2 }
  0x16   :  { %p2338_p10 = pnand %p2336_p9, %p2333_p8 }
  0x18   :  { %2341 = shalt.err (!%p2338_p10)
}
  0x19   :  { %s2342_s24 = scalar_lea.vmem %s2429_s27, 4096  ;;  %p2347_p12 = scmp.lt.s32.totalorder %s2429_s27, %s2429_s27 }
  0x1a   :  { %p2343_p11 = scmp.ne.s32.totalorder %s2429_s27, %s2342_s24  ;;  %p2348_p13 = scmp.lt.s32.totalorder %s2342_s24, %s2342_s24 }
  0x1c   :  { %p2349_p0 = por %p2348_p13, %p2347_p12 }
  0x1e   :  { %p2350_p1 = pnand %p2349_p0, %p2343_p11 }
  0x20   :  { %2353 = shalt.err (!%p2350_p1)
}
  0x21   :  { %29 = dma.hbm_to_vmem [thread:$0]  %s3118_s2, 4096, %s2429_s27, [#allocation5], %s2382_s13, %s2382_s13, %s2383_s14  }
  0x22   :  { %s2384_s26 = smov [#allocation8]   ;;  %s2354_s8 = scalar_lea.hbm %s3121_s5, 1024 }
  0x23   :  { %s49_s28 = sshll.u32 %s2384_s26, 4  ;;  %p2355_p2 = scmp.ne.s32.totalorder %s3121_s5, %s2354_s8  ;;  %s50_s28 = int_to_ptr.vmem [resolvable:$true] %s49_s28 }
  0x24   :  { %p2358_p3 = scmp.lt.u32.totalorder %s2354_s8, %s3121_s5 }
  0x26   :  { %p2360_p4 = pnand %p2358_p3, %p2355_p2 }
  0x28   :  { %2363 = shalt.err (!%p2360_p4)
}
  0x29   :  { %s2364_s15 = scalar_lea.vmem %s50_s28, 1024  ;;  %p2369_p6 = scmp.lt.s32.totalorder %s50_s28, %s50_s28 }
  0x2a   :  { %p2365_p5 = scmp.ne.s32.totalorder %s50_s28, %s2364_s15  ;;  %p2370_p7 = scmp.lt.s32.totalorder %s2364_s15, %s2364_s15 }
  0x2c   :  { %p2371_p8 = por %p2370_p7, %p2369_p6 }
  0x2e   :  { %p2372_p9 = pnand %p2371_p8, %p2365_p5 }
  0x30   :  { %2375 = shalt.err (!%p2372_p9)
}
  0x31   :  { %s2385_s2 = smov 64   ;;  %s2386_s27 = smov 4  }
  0x32   :  { %55 = dma.hbm_to_vmem [thread:$0]  %s3121_s5, 1024, %s50_s28, [#allocation7], %s2385_s2, %s2385_s2, %s2386_s27  }
  0x33   :  { %2376 = dma.done.wait [#allocation5], 4096  }
  0x34   :  { %2377 = vsyncadd [#allocation5], 4294963200 }
  0x35   :  { %2378 = dma.done.wait [#allocation7], 5120  }
  0x36   :  { %2379 = vsyncadd [#allocation7], 4294962176  ;;  %v3124_v0 = vmov 0   ;;  %v70_v1 = vld [vmem:[%s3116_s0 + $0x10] sm:$0xff]  ;;  %v68_v2 = vld [vmem:[%s3116_s0] sm:$0xff]  ;;  %v76_v32 = vlaneseq }
  0x37   :  { %2081 = vset.pattern.permute.xlu1 %v3124_v0  ;;  %2080 = vset.pattern.permute.xlu0 %v3124_v0  ;;  %v71_v3 = vld [vmem:[%s3116_s0 + $0x18] sm:$0xff]  ;;  %v69_v4 = vld [vmem:[%s3116_s0 + $0x8] sm:$0xff]  ;;  %v2082_v5 = vld [vmem:[%s3117_s1] sm:$0xff]   ;;  %v2388_v40 = vmov 1.0|1.0  }
  0x38   :  { %501 = vmatprep.mubr.bf16.mxu1 %v3124_v0  ;;  %85 = vperm.xlu1 %2081, %v70_v1   ;;  %v2083_v6 = vld [vmem:[%s3117_s1 + $0x8] sm:$0xff]   ;;  %v72_v8 = vld [vmem:[%s3116_s0 + $0x20] sm:$0xff]  ;;  %v75_v9 = vld [vmem:[%s3116_s0 + $0x38] sm:$0xff]  ;;  %v77_v35 = vand.u32 127, %v76_v32 }
  0x39   :  { %79 = vperm.xlu0 %2080, %v68_v2   ;;  %v73_v7 = vld [vmem:[%s3116_s0 + $0x28] sm:$0xff]  ;;  %2023 = vmatprep.subr.bf16.mxu0 %v2082_v5  ;;  %v2084_v10 = vld [vmem:[%s3117_s1 + $0x10] sm:$0xff]   ;;  %v2085_v12 = vld [vmem:[%s3117_s1 + $0x18] sm:$0xff]  }
  0x3a   :  { %2024 = vmatpush3.bf16.msra.mxu0 %v2082_v5  ;;  %v74_v11 = vld [vmem:[%s3116_s0 + $0x30] sm:$0xff]  ;;  %v2086_v13 = vld [vmem:[%s3117_s1 + $0x20] sm:$0xff]   ;;  %v2087_v17 = vld [vmem:[%s3117_s1 + $0x28] sm:$0xff]  }
  0x3b   :  { %2025 = vmatprep.subr.bf16.mxu0 %v2083_v6  ;;  %v2090_v14 = vld [vmem:[#allocation4 + $0x4] ss:$16 sps:$4 sm:$0xff]   ;;  %v2095_v15 = vld [vmem:[#allocation4] ss:$16 sps:$4 sm:$0xff]   ;;  %v2089_v23 = vld [vmem:[%s3117_s1 + $0x38] sm:$0xff]  }
  0x3c   :  { %88 = vperm.xlu1 %2081, %v71_v3   ;;  %v2096_v16 = vld [vmem:[#allocation4 + $0x24] ss:$16 sps:$4 sm:$0xff]   ;;  %469 = vmatprep.subr.bf16.mxu1 %v2090_v14  ;;  %v2101_v18 = vld [vmem:[#allocation4 + $0x20] ss:$16 sps:$4 sm:$0xff]   ;;  %v2094_v26 = vld [vmem:[#allocation4 + $0xc] ss:$16 sps:$4 sm:$0xff]  }
  0x3d   :  { %82 = vperm.xlu0 %2080, %v69_v4   ;;  %470 = vmatpush1.bf16.msra.mxu1 %v2095_v15  ;;  %v2102_v19 = vld [vmem:[#allocation4 + $0x44] ss:$16 sps:$4 sm:$0xff]   ;;  %v2107_v21 = vld [vmem:[#allocation4 + $0x40] ss:$16 sps:$4 sm:$0xff]   ;;  %v2092_v38 = vld [vmem:[#allocation4 + $0x8] ss:$16 sps:$4 sm:$0xff]  }
  0x3e   :  { %2026 = vmatpush3.bf16.msra.mxu0 %v2083_v6  ;;  %471 = vmatprep.subr.bf16.mxu1 %v2096_v16  ;;  %v2088_v20 = vld [vmem:[%s3117_s1 + $0x30] sm:$0xff]   ;;  %v2100_v39 = vld [vmem:[#allocation4 + $0x2c] ss:$16 sps:$4 sm:$0xff]   ;;  %v2098_v43 = vld [vmem:[#allocation4 + $0x28] ss:$16 sps:$4 sm:$0xff]  }
  0x3f   :  { %2027 = vmatprep.subr.bf16.mxu0 %v2084_v10  ;;  %v2108_v22 = vld [vmem:[#allocation4 + $0x64] ss:$16 sps:$4 sm:$0xff]   ;;  %v2113_v24 = vld [vmem:[#allocation4 + $0x60] ss:$16 sps:$4 sm:$0xff]   ;;  %v2106_v44 = vld [vmem:[#allocation4 + $0x4c] ss:$16 sps:$4 sm:$0xff]  }
  0x40   :  { %94 = vperm.xlu1 %2081, %v73_v7   ;;  %v2114_v25 = vld [vmem:[#allocation4 + $0x84] ss:$16 sps:$4 sm:$0xff]   ;;  %v2119_v27 = vld [vmem:[#allocation4 + $0x80] ss:$16 sps:$4 sm:$0xff]   ;;  %v2104_v47 = vld [vmem:[#allocation4 + $0x48] ss:$16 sps:$4 sm:$0xff]  }
  0x41   :  { %91 = vperm.xlu0 %2080, %v72_v8   ;;  %472 = vmatpush1.bf16.msra.mxu1 %v2101_v18  ;;  %v2120_v28 = vld [vmem:[#allocation4 + $0xa4] ss:$16 sps:$4 sm:$0xff]   ;;  %v2125_v29 = vld [vmem:[#allocation4 + $0xa0] ss:$16 sps:$4 sm:$0xff]   ;;  %v2112_v48 = vld [vmem:[#allocation4 + $0x6c] ss:$16 sps:$4 sm:$0xff]  }
  0x42   :  { %2028 = vmatpush3.bf16.msra.mxu0 %v2084_v10  ;;  %473 = vmatprep.subr.bf16.mxu1 %v2102_v19  ;;  %v2126_v30 = vld [vmem:[#allocation4 + $0xc4] ss:$16 sps:$4 sm:$0xff]   ;;  %v2131_v31 = vld [vmem:[#allocation4 + $0xc0] ss:$16 sps:$4 sm:$0xff]   ;;  %v2110_v49 = vld [vmem:[#allocation4 + $0x68] ss:$16 sps:$4 sm:$0xff]  }
  0x43   :  { %2029 = vmatprep.subr.bf16.mxu0 %v2085_v12  ;;  %v2118_v50 = vld [vmem:[#allocation4 + $0x8c] ss:$16 sps:$4 sm:$0xff]   ;;  %v2116_v51 = vld [vmem:[#allocation4 + $0x88] ss:$16 sps:$4 sm:$0xff]   ;;  %v2132_v56 = vld [vmem:[#allocation4 + $0xe4] ss:$16 sps:$4 sm:$0xff]  }
  0x44   :  { %100 = vperm.xlu1 %2081, %v75_v9   ;;  %v2124_v52 = vld [vmem:[#allocation4 + $0xac] ss:$16 sps:$4 sm:$0xff]   ;;  %v2122_v53 = vld [vmem:[#allocation4 + $0xa8] ss:$16 sps:$4 sm:$0xff]   ;;  %v2137_v59 = vld [vmem:[#allocation4 + $0xe0] ss:$16 sps:$4 sm:$0xff]  }
  0x45   :  { %97 = vperm.xlu0 %2080, %v74_v11   ;;  %474 = vmatpush1.bf16.msra.mxu1 %v2107_v21  ;;  %v2130_v54 = vld [vmem:[#allocation4 + $0xcc] ss:$16 sps:$4 sm:$0xff]   ;;  %v2128_v55 = vld [vmem:[#allocation4 + $0xc8] ss:$16 sps:$4 sm:$0xff]   ;;  %v2533_v9 = vld [vmem:[#allocation6 + $0x4] ss:$16 sps:$4 sm:$0xff]  }
  0x46   :  { %2030 = vmatpush3.bf16.msra.mxu0 %v2085_v12  ;;  %475 = vmatprep.subr.bf16.mxu1 %v2108_v22  ;;  %v2136_v57 = vld [vmem:[#allocation4 + $0xec] ss:$16 sps:$4 sm:$0xff]   ;;  %v2134_v58 = vld [vmem:[#allocation4 + $0xe8] ss:$16 sps:$4 sm:$0xff]   ;;  %v2537_v11 = vld [vmem:[#allocation6] ss:$16 sps:$4 sm:$0xff]  }
  0x47   :  { %2031 = vmatprep.subr.bf16.mxu0 %v2086_v13  ;;  %v2535_v10 = vld [vmem:[#allocation6 + $0xc] ss:$16 sps:$4 sm:$0xff]   ;;  %v2539_v12 = vld [vmem:[#allocation6 + $0x8] ss:$16 sps:$4 sm:$0xff]   ;;  %v2549_v15 = vld [vmem:[#allocation6 + $0x20] ss:$16 sps:$4 sm:$0xff]  }
  0x48   :  { %v2547_v14 = vld [vmem:[#allocation6 + $0x2c] ss:$16 sps:$4 sm:$0xff]   ;;  %v2551_v16 = vld [vmem:[#allocation6 + $0x28] ss:$16 sps:$4 sm:$0xff]   ;;  %v2561_v19 = vld [vmem:[#allocation6 + $0x40] ss:$16 sps:$4 sm:$0xff]  }
  0x49   :  { %476 = vmatpush1.bf16.msra.mxu1 %v2113_v24  ;;  %v2559_v18 = vld [vmem:[#allocation6 + $0x4c] ss:$16 sps:$4 sm:$0xff]   ;;  %v2569_v21 = vld [vmem:[#allocation6 + $0x64] ss:$16 sps:$4 sm:$0xff]   ;;  %v2575_v24 = vld [vmem:[#allocation6 + $0x68] ss:$16 sps:$4 sm:$0xff]  }
  0x4a   :  { %2032 = vmatpush3.bf16.msra.mxu0 %v2086_v13  ;;  %477 = vmatprep.subr.bf16.mxu1 %v2114_v25  ;;  %v2545_v13 = vld [vmem:[#allocation6 + $0x24] ss:$16 sps:$4 sm:$0xff]   ;;  %v2571_v22 = vld [vmem:[#allocation6 + $0x6c] ss:$16 sps:$4 sm:$0xff]  }
  0x4b   :  { %2033 = vmatprep.subr.bf16.mxu0 %v2087_v17  ;;  %v2581_v25 = vld [vmem:[#allocation6 + $0x84] ss:$16 sps:$4 sm:$0xff]  }
  0x4d   :  { %478 = vmatpush1.bf16.msra.mxu1 %v2119_v27  ;;  %v2585_v27 = vld [vmem:[#allocation6 + $0x80] ss:$16 sps:$4 sm:$0xff]  }
  0x4e   :  { %2034 = vmatpush3.bf16.msra.mxu0 %v2087_v17  ;;  %479 = vmatprep.subr.bf16.mxu1 %v2120_v28  ;;  %v2557_v17 = vld [vmem:[#allocation6 + $0x44] ss:$16 sps:$4 sm:$0xff]   ;;  %v2587_v28 = vld [vmem:[#allocation6 + $0x88] ss:$16 sps:$4 sm:$0xff]  }
  0x4f   :  { %2035 = vmatprep.subr.bf16.mxu0 %v2088_v20 }
  0x51   :  { %480 = vmatpush1.bf16.msra.mxu1 %v2125_v29  ;;  %v2593_v29 = vld [vmem:[#allocation6 + $0xa4] ss:$16 sps:$4 sm:$0xff]  }
  0x52   :  { %2036 = vmatpush3.bf16.msra.mxu0 %v2088_v20  ;;  %481 = vmatprep.subr.bf16.mxu1 %v2126_v30  ;;  %v2563_v20 = vld [vmem:[#allocation6 + $0x48] ss:$16 sps:$4 sm:$0xff]   ;;  %v2595_v30 = vld [vmem:[#allocation6 + $0xac] ss:$16 sps:$4 sm:$0xff]  }
  0x53   :  { %2037 = vmatprep.subr.bf16.mxu0 %v2089_v23 }
  0x55   :  { %482 = vmatpush1.bf16.msra.mxu1 %v2131_v31  ;;  %v2597_v31 = vld [vmem:[#allocation6 + $0xa0] ss:$16 sps:$4 sm:$0xff]  }
  0x56   :  { %2038 = vmatpush3.bf16.msra.mxu0 %v2089_v23  ;;  %483 = vmatprep.subr.bf16.mxu1 %v2132_v56  ;;  %v2573_v23 = vld [vmem:[#allocation6 + $0x60] ss:$16 sps:$4 sm:$0xff]  }
  0x57   :  { %542 = vmatprep.subr.bf16.mxu0 %v2094_v26  ;;  %v2583_v26 = vld [vmem:[#allocation6 + $0x8c] ss:$16 sps:$4 sm:$0xff]  }
  0x59   :  { %484 = vmatpush1.bf16.msra.mxu1 %v2137_v59 }
  0x5a   :  { %863 = vmatprep.subr.bf16.mxu1 %v2533_v9 }
  0xb7   :  { %v86_v33 = vpop.permute.xlu1 %85 }
  0xb8   :  { %v80_v34 = vpop.permute.xlu0 %79  ;;  %vm104_vm0 = vcmp.eq.s32.totalorder %v86_v33, %v77_v35  ;;  %v2599_v33 = vld [vmem:[#allocation6 + $0xa8] ss:$16 sps:$4 sm:$0xff]  }
  0xb9   :  { %vm102_vm3 = vcmp.eq.s32.totalorder %v80_v34, %v77_v35  ;;  %v2605_v34 = vld [vmem:[#allocation6 + $0xc4] ss:$16 sps:$4 sm:$0xff]  }
  0xbb   :  { %v89_v36 = vpop.permute.xlu1 %88 }
  0xbc   :  { %v83_v37 = vpop.permute.xlu0 %82  ;;  %vm105_vm1 = vcmp.eq.s32.totalorder %v89_v36, %v77_v35  ;;  %v2609_v36 = vld [vmem:[#allocation6 + $0xc0] ss:$16 sps:$4 sm:$0xff]  }
  0xbd   :  { %vm103_vm2 = vcmp.eq.s32.totalorder %v83_v37, %v77_v35  ;;  %vm1920_vm4 = vmpackc.low %vm105_vm1, %vm104_vm0  ;;  %v2611_v37 = vld [vmem:[#allocation6 + $0xc8] ss:$16 sps:$4 sm:$0xff]  }
  0xbe   :  { %vm1918_vm5 = vmpackc.low %vm103_vm2, %vm102_vm3 }
  0xbf   :  { %2039 = vmatprep.mubr.msk.bf16.mxu0 %vm1918_vm5, %v2388_v40  ;;  %v95_v41 = vpop.permute.xlu1 %94 }
  0xc0   :  { %v92_v42 = vpop.permute.xlu0 %91  ;;  %vm107_vm6 = vcmp.eq.s32.totalorder %v95_v41, %v77_v35  ;;  %2040 = vmatmul.mubr.msk.bf16.vlgmr.msra.gmra.mrb[0].mxu0 %vm1920_vm4, %v2388_v40  ;;  %v2623_v41 = vld [vmem:[#allocation6 + $0xe8] ss:$16 sps:$4 sm:$0xff]  }
  0xc1   :  { %vm106_vm7 = vcmp.eq.s32.totalorder %v92_v42, %v77_v35  ;;  %543 = vmatpush1.bf16.msra.mxu0 %v2092_v38  ;;  %v2617_v38 = vld [vmem:[#allocation6 + $0xe4] ss:$16 sps:$4 sm:$0xff]   ;;  %v290_v42 = vshrl.u32 %v76_v32, 7 }
  0xc2   :  { %vm1922_vm8 = vmpackc.low %vm107_vm6, %vm106_vm7  ;;  %544 = vmatprep.subr.bf16.mxu0 %v2100_v39  ;;  %v2619_v39 = vld [vmem:[#allocation6 + $0xec] ss:$16 sps:$4 sm:$0xff]  }
  0xc3   :  { %2043 = vmatprep.mubr.msk.bf16.mxu0 %vm1922_vm8, %v2388_v40  ;;  %v101_v45 = vpop.permute.xlu1 %100 }
  0xc4   :  { %v98_v46 = vpop.permute.xlu0 %97  ;;  %vm109_vm9 = vcmp.eq.s32.totalorder %v101_v45, %v77_v35 }
  0xc5   :  { %vm108_vm10 = vcmp.eq.s32.totalorder %v98_v46, %v77_v35  ;;  %545 = vmatpush1.bf16.msra.mxu0 %v2098_v43  ;;  %v2607_v35 = vld [vmem:[#allocation6 + $0xcc] ss:$16 sps:$4 sm:$0xff]   ;;  %v291_v43 = vsub.s32 0, %v290_v42  ;;  %v299_v46 = vsub.s32 2, %v290_v42 }
  0xc6   :  { %vm1924_vm11 = vmpackc.low %vm109_vm9, %vm108_vm10  ;;  %546 = vmatprep.subr.bf16.mxu0 %v2106_v44  ;;  %v287_v44 = vld [vmem:[%s3120_s4] sm:$0xf] }
  0xc7   :  { %v2635_v45 = vrot.slane %v287_v44, %v291_v43 }
  0xc8   :  { %2044 = vmatmul.mubr.msk.bf16.gmra.mrb[4].mxu0 %vm1924_vm11, %v2388_v40  ;;  %v2621_v40 = vld [vmem:[#allocation6 + $0xe0] ss:$16 sps:$4 sm:$0xff]  }
  0xc9   :  { %547 = vmatpush1.bf16.msra.mxu0 %v2104_v47  ;;  %574 = vmatprep.mubr.bf16.mxu0 %v3124_v0  ;;  %v303_v47 = vsub.s32 3, %v290_v42 }
  0xca   :  { %548 = vmatprep.subr.bf16.mxu0 %v2112_v48 }
  0xcd   :  { %549 = vmatpush1.bf16.msra.mxu0 %v2110_v49 }
  0xce   :  { %550 = vmatprep.subr.bf16.mxu0 %v2118_v50 }
  0xd1   :  { %551 = vmatpush1.bf16.msra.mxu0 %v2116_v51  ;;  %v2638_v51 = vrot.slane %v287_v44, %v299_v46 }
  0xd2   :  { %552 = vmatprep.subr.bf16.mxu0 %v2124_v52 }
  0xd5   :  { %553 = vmatpush1.bf16.msra.mxu0 %v2122_v53 }
  0xd6   :  { %554 = vmatprep.subr.bf16.mxu0 %v2130_v54  ;;  %v2640_v54 = vrot.slane %v287_v44, %v303_v47 }
  0xd9   :  { %555 = vmatpush1.bf16.msra.mxu0 %v2128_v55 }
  0xda   :  { %556 = vmatprep.subr.bf16.mxu0 %v2136_v57 }
  0xdd   :  { %557 = vmatpush1.bf16.msra.mxu0 %v2134_v58 }
  0xde   :  { %904 = vmatprep.subr.bf16.mxu0 %v2535_v10 }
 0x193   :  { %v2041_v60 = vpop.f32.mrb[0].mxu0 }
 0x194   :  { %v220_v61 = vpop.f32.mrb[1].mxu0 }
 0x195   :  { %v2042_v62 = vpop.f32.mrb[2].mxu0 }
 0x196   :  { %v252_v63 = vpack.c.bf16 %v2042_v62, %v2041_v60  ;;  %v223_v1 = vpop.f32.mrb[3].mxu0 }
 0x197   :  { %v251_v2 = vpack.c.bf16 %v223_v1, %v220_v61  ;;  %v295_v61 = vsub.s32 1, %v290_v42 }
 0x199   :  { %502 = vmatmul.mubr.bf16.vlgmr.msra.gmra.mrb[0].mxu1 %v251_v2  ;;  %575 = vmatmul.mubr.bf16.vlgmr.msra.gmra.mrb[8].mxu0 %v251_v2  ;;  %v2655_v2 = vrot.slane %v287_v44, %v295_v61 }
 0x19a   :  { %511 = vmatprep.mubr.bf16.mxu1 %v3124_v0  ;;  %584 = vmatprep.mubr.bf16.mxu0 %v3124_v0 }
 0x19b   :  { %v2045_v3 = vpop.f32.mrb[4].mxu0  ;;  %864 = vmatpush1.bf16.msra.mxu1 %v2537_v11  ;;  %905 = vmatpush1.bf16.msra.mxu0 %v2539_v12 }
 0x19c   :  { %v236_v4 = vpop.f32.mrb[5].mxu0  ;;  %865 = vmatprep.subr.bf16.mxu1 %v2545_v13  ;;  %906 = vmatprep.subr.bf16.mxu0 %v2547_v14 }
 0x19d   :  { %v2046_v5 = vpop.f32.mrb[6].mxu0 }
 0x19e   :  { %v254_v6 = vpack.c.bf16 %v2046_v5, %v2045_v3  ;;  %v239_v7 = vpop.f32.mrb[7].mxu0 }
 0x19f   :  { %v253_v8 = vpack.c.bf16 %v239_v7, %v236_v4  ;;  %866 = vmatpush1.bf16.msra.mxu1 %v2549_v15  ;;  %907 = vmatpush1.bf16.msra.mxu0 %v2551_v16 }
 0x1a0   :  { %867 = vmatprep.subr.bf16.mxu1 %v2557_v17  ;;  %908 = vmatprep.subr.bf16.mxu0 %v2559_v18 }
 0x1a1   :  { %512 = vmatmul.mubr.bf16.gmra.mrb[4].mxu1 %v252_v63  ;;  %585 = vmatmul.mubr.bf16.gmra.mrb[12].mxu0 %v252_v63 }
 0x1a2   :  { %521 = vmatprep.mubr.bf16.mxu1 %v3124_v0  ;;  %594 = vmatprep.mubr.bf16.mxu0 %v3124_v0 }
 0x1a3   :  { %868 = vmatpush1.bf16.msra.mxu1 %v2561_v19  ;;  %909 = vmatpush1.bf16.msra.mxu0 %v2563_v20 }
 0x1a4   :  { %869 = vmatprep.subr.bf16.mxu1 %v2569_v21  ;;  %910 = vmatprep.subr.bf16.mxu0 %v2571_v22 }
 0x1a7   :  { %870 = vmatpush1.bf16.msra.mxu1 %v2573_v23  ;;  %911 = vmatpush1.bf16.msra.mxu0 %v2575_v24 }
 0x1a8   :  { %871 = vmatprep.subr.bf16.mxu1 %v2581_v25  ;;  %912 = vmatprep.subr.bf16.mxu0 %v2583_v26 }
 0x1a9   :  { %522 = vmatmul.mubr.bf16.gmra.mrb[8].mxu1 %v253_v8  ;;  %595 = vmatmul.mubr.bf16.gmra.mrb[16].mxu0 %v253_v8 }
 0x1aa   :  { %531 = vmatprep.mubr.bf16.mxu1 %v3124_v0  ;;  %604 = vmatprep.mubr.bf16.mxu0 %v3124_v0 }
 0x1ab   :  { %872 = vmatpush1.bf16.msra.mxu1 %v2585_v27  ;;  %913 = vmatpush1.bf16.msra.mxu0 %v2587_v28 }
 0x1ac   :  { %873 = vmatprep.subr.bf16.mxu1 %v2593_v29  ;;  %914 = vmatprep.subr.bf16.mxu0 %v2595_v30 }
 0x1af   :  { %874 = vmatpush1.bf16.msra.mxu1 %v2597_v31  ;;  %915 = vmatpush1.bf16.msra.mxu0 %v2599_v33 }
 0x1b0   :  { %875 = vmatprep.subr.bf16.mxu1 %v2605_v34  ;;  %916 = vmatprep.subr.bf16.mxu0 %v2607_v35 }
 0x1b1   :  { %532 = vmatmul.mubr.bf16.gmra.mrb[12].mxu1 %v254_v6  ;;  %605 = vmatmul.mubr.bf16.gmra.mrb[20].mxu0 %v254_v6 }
 0x1b2   :  { %895 = vmatprep.mubr.bf16.mxu1 %v3124_v0  ;;  %936 = vmatprep.mubr.bf16.mxu0 %v3124_v0 }
 0x1b3   :  { %876 = vmatpush1.bf16.msra.mxu1 %v2609_v36  ;;  %917 = vmatpush1.bf16.msra.mxu0 %v2611_v37 }
 0x1b4   :  { %877 = vmatprep.subr.bf16.mxu1 %v2617_v38  ;;  %918 = vmatprep.subr.bf16.mxu0 %v2619_v39 }
 0x1b7   :  { %878 = vmatpush1.bf16.msra.mxu1 %v2621_v40  ;;  %919 = vmatpush1.bf16.msra.mxu0 %v2623_v41 }
 0x1b8   :  { %977 = vmatprep.subr.bf16.mxu1 %v2533_v9  ;;  %1018 = vmatprep.subr.bf16.mxu0 %v2535_v10 }
 0x26c   :  { %v503_v48 = vpop.f32.mrb[0].mxu1  ;;  %v576_v49 = vpop.f32.mrb[8].mxu0 }
 0x26d   :  { %v504_v50 = vadd.f32 %v503_v48, %v2635_v45  ;;  %v505_v52 = vpop.f32.mrb[1].mxu1  ;;  %v578_v53 = vpop.f32.mrb[9].mxu0  ;;  %v577_v63 = vadd.f32 %v576_v49, %v2638_v51 }
 0x26e   :  { %v507_v32 = vpop.f32.mrb[2].mxu1  ;;  %v580_v55 = vpop.f32.mrb[10].mxu0  ;;  %v579_v1 = vadd.f32 %v578_v53, %v2640_v54 }
 0x26f   :  { %v682_v56 = vmul.f32 0.5, %v504_v50  ;;  %v2643_v57 = vadd.f32 %v507_v32, %v2635_v45  ;;  %v2646_v58 = vadd.f32 %v580_v55, %v2638_v51  ;;  %v2648_v59 = vpop.f32.mrb[3].mxu1  ;;  %v582_v60 = vpop.f32.mrb[11].mxu0 }
 0x270   :  { %v2651_v62 = vadd.f32 %v582_v60, %v2640_v54  ;;  %v687_v42 = vmul.f32 0.5, %v579_v1 }
 0x271   :  { %2194 = vtanh.f32 %v682_v56 }
 0x272   :  { %2196 = vtanh.f32 %v577_v63 }
 0x273   :  { %2198 = vtanh.f32 %v687_v42 }
 0x274   :  { %v513_v3 = vpop.f32.mrb[4].mxu1  ;;  %v586_v4 = vpop.f32.mrb[12].mxu0 }
 0x275   :  { %v2658_v5 = vadd.f32 %v513_v3, %v2635_v45  ;;  %v2661_v6 = vadd.f32 %v586_v4, %v2638_v51  ;;  %v515_v7 = vpop.f32.mrb[5].mxu1  ;;  %v588_v8 = vpop.f32.mrb[13].mxu0 }
 0x276   :  { %v2664_v43 = vadd.f32 %v515_v7, %v2655_v2  ;;  %v2667_v46 = vadd.f32 %v588_v8, %v2640_v54  ;;  %v517_v44 = vpop.f32.mrb[6].mxu1  ;;  %v590_v47 = vpop.f32.mrb[14].mxu0 }
 0x277   :  { %v2670_v48 = vadd.f32 %v517_v44, %v2635_v45  ;;  %v2673_v49 = vadd.f32 %v590_v47, %v2638_v51  ;;  %v519_v50 = vpop.f32.mrb[7].mxu1  ;;  %v592_v52 = vpop.f32.mrb[15].mxu0 }
 0x278   :  { %v2676_v53 = vadd.f32 %v519_v50, %v2655_v2  ;;  %v2679_v32 = vadd.f32 %v592_v52, %v2640_v54 }
 0x27b   :  { %v2195_v55 = vpop.eup %2194 }
 0x27c   :  { %v684_v56 = vadd.f32 1.0, %v2195_v55  ;;  %v523_v60 = vpop.f32.mrb[8].mxu1  ;;  %v596_v61 = vpop.f32.mrb[16].mxu0 }
 0x27d   :  { %v2682_v63 = vadd.f32 %v523_v60, %v2635_v45  ;;  %v2685_v1 = vadd.f32 %v596_v61, %v2638_v51  ;;  %v525_v3 = vpop.f32.mrb[9].mxu1  ;;  %v598_v4 = vpop.f32.mrb[17].mxu0 }
 0x27e   :  { %v685_v7 = vmul.f32 0.5, %v684_v56  ;;  %v2688_v8 = vadd.f32 %v525_v3, %v2655_v2  ;;  %v2691_v44 = vadd.f32 %v598_v4, %v2640_v54  ;;  %v527_v42 = vpop.f32.mrb[10].mxu1  ;;  %v600_v47 = vpop.f32.mrb[18].mxu0 }
 0x27f   :  { %3127 = vst [vmem:[#allocation11_spill] sm:$0xff] %v2685_v1  ;;  %v2197_v50 = vpop.eup %2196  ;;  %v2694_v52 = vadd.f32 %v527_v42, %v2635_v45  ;;  %v2697_v55 = vadd.f32 %v600_v47, %v2638_v51  ;;  %v529_v60 = vpop.f32.mrb[11].mxu1 }
 0x280   :  { %3128 = vst [vmem:[#allocation12_spill] sm:$0xff] %v2688_v8  ;;  %3129 = vst [vmem:[#allocation13_spill] sm:$0xff] %v2691_v44  ;;  %v602_v61 = vpop.f32.mrb[19].mxu0  ;;  %v2699_v0 = vmul.f32 %v2197_v50, %v685_v7  ;;  %v2702_v56 = vadd.f32 %v529_v60, %v2655_v2  ;;  %v2199_v4 = vpop.eup %2198 }
 0x281   :  { %3130 = vst [vmem:[#allocation14_spill] sm:$0xff] %v2694_v52  ;;  %3131 = vst [vmem:[#allocation15_spill] sm:$0xff] %v2697_v55  ;;  %v2705_v3 = vadd.f32 %v602_v61, %v2640_v54 }
 0x282   :  { %3132 = vst [vmem:[#allocation16_spill] sm:$0xff] %v2702_v56  ;;  %2200 = vtanh.f32 %v2699_v0  ;;  %v689_v56 = vadd.f32 1.0, %v2199_v4 }
 0x283   :  { %3133 = vst [vmem:[#allocation17_spill] sm:$0xff] %v2705_v3 }
 0x284   :  { %v533_v44 = vpop.f32.mrb[12].mxu1  ;;  %v606_v8 = vpop.f32.mrb[20].mxu0 }
 0x285   :  { %v2709_v42 = vadd.f32 %v533_v44, %v2635_v45  ;;  %v2712_v47 = vadd.f32 %v606_v8, %v2638_v51  ;;  %v535_v55 = vpop.f32.mrb[13].mxu1  ;;  %v608_v7 = vpop.f32.mrb[21].mxu0 }
 0x286   :  { %v2715_v50 = vadd.f32 %v535_v55, %v2655_v2  ;;  %v2718_v60 = vadd.f32 %v608_v7, %v2640_v54  ;;  %v537_v61 = vpop.f32.mrb[14].mxu1  ;;  %v610_v3 = vpop.f32.mrb[22].mxu0 }
 0x287   :  { %3134 = vst [vmem:[#allocation18_spill] sm:$0xff] %v2709_v42  ;;  %3135 = vst [vmem:[#allocation19_spill] sm:$0xff] %v2712_v47  ;;  %v2721_v52 = vadd.f32 %v537_v61, %v2635_v45  ;;  %v2724_v44 = vadd.f32 %v610_v3, %v2638_v51  ;;  %v539_v42 = vpop.f32.mrb[15].mxu1  ;;  %v612_v8 = vpop.f32.mrb[23].mxu0  ;;  %v3143_v45 = vmov 0   ;;  %v510_v51 = vadd.f32 %v2648_v59, %v2655_v2 }
 0x288   :  { %3136 = vst [vmem:[#allocation20_spill] sm:$0xff] %v2715_v50  ;;  %3137 = vst [vmem:[#allocation21_spill] sm:$0xff] %v2718_v60  ;;  %v2727_v47 = vadd.f32 %v539_v42, %v2655_v2  ;;  %v2730_v55 = vadd.f32 %v612_v8, %v2640_v54  ;;  %v690_v50 = vmul.f32 0.5, %v689_v56 }
 0x289   :  { %3138 = vst [vmem:[#allocation22_spill] sm:$0xff] %v2721_v52  ;;  %3139 = vst [vmem:[#allocation23_spill] sm:$0xff] %v2724_v44 }
 0x28a   :  { %3140 = vst [vmem:[#allocation24_spill] sm:$0xff] %v2727_v47  ;;  %3141 = vst [vmem:[#allocation25_spill] sm:$0xff] %v2730_v55 }
 0x28c   :  { %v2201_v7 = vpop.eup %2200 }
 0x28d   :  { %v2732_v60 = vmul.f32 %v2201_v7, %v690_v50 }
 0x28f   :  { %3142 = vst [vmem:[#allocation26_spill] sm:$0xff] %v2732_v60  ;;  %v702_v4 = vpack.c.bf16 %v2732_v60, %v2732_v60 }
 0x291   :  { %896 = vmatmul.mubr.bf16.vlgmr.msra.gmra.mrb[16].mxu1 %v702_v4  ;;  %937 = vmatmul.mubr.bf16.vlgmr.msra.gmra.mrb[24].mxu0 %v702_v4 }
 0x292   :  { %978 = vmatpush1.bf16.msra.mxu1 %v2537_v11  ;;  %1019 = vmatpush1.bf16.msra.mxu0 %v2539_v12 }
 0x293   :  { %979 = vmatprep.subr.bf16.mxu1 %v2545_v13  ;;  %1020 = vmatprep.subr.bf16.mxu0 %v2547_v14 }
 0x294   :  { %1009 = vmatprep.mubr.bf16.mxu1 %v3143_v45  ;;  %1050 = vmatprep.mubr.bf16.mxu0 %v3143_v45 }
 0x296   :  { %980 = vmatpush1.bf16.msra.mxu1 %v2549_v15  ;;  %1021 = vmatpush1.bf16.msra.mxu0 %v2551_v16 }
 0x297   :  { %981 = vmatprep.subr.bf16.mxu1 %v2557_v17  ;;  %1022 = vmatprep.subr.bf16.mxu0 %v2559_v18 }
 0x29a   :  { %982 = vmatpush1.bf16.msra.mxu1 %v2561_v19  ;;  %1023 = vmatpush1.bf16.msra.mxu0 %v2563_v20 }
 0x29b   :  { %983 = vmatprep.subr.bf16.mxu1 %v2569_v21  ;;  %1024 = vmatprep.subr.bf16.mxu0 %v2571_v22 }
 0x29e   :  { %984 = vmatpush1.bf16.msra.mxu1 %v2573_v23  ;;  %1025 = vmatpush1.bf16.msra.mxu0 %v2575_v24 }
 0x29f   :  { %985 = vmatprep.subr.bf16.mxu1 %v2581_v25  ;;  %1026 = vmatprep.subr.bf16.mxu0 %v2583_v26 }
 0x2a2   :  { %986 = vmatpush1.bf16.msra.mxu1 %v2585_v27  ;;  %1027 = vmatpush1.bf16.msra.mxu0 %v2587_v28 }
 0x2a3   :  { %987 = vmatprep.subr.bf16.mxu1 %v2593_v29  ;;  %1028 = vmatprep.subr.bf16.mxu0 %v2595_v30 }
 0x2a6   :  { %988 = vmatpush1.bf16.msra.mxu1 %v2597_v31  ;;  %1029 = vmatpush1.bf16.msra.mxu0 %v2599_v33 }
 0x2a7   :  { %989 = vmatprep.subr.bf16.mxu1 %v2605_v34  ;;  %1030 = vmatprep.subr.bf16.mxu0 %v2607_v35 }
 0x2aa   :  { %990 = vmatpush1.bf16.msra.mxu1 %v2609_v36  ;;  %1031 = vmatpush1.bf16.msra.mxu0 %v2611_v37 }
 0x2ab   :  { %991 = vmatprep.subr.bf16.mxu1 %v2617_v38  ;;  %1032 = vmatprep.subr.bf16.mxu0 %v2619_v39 }
 0x2ae   :  { %992 = vmatpush1.bf16.msra.mxu1 %v2621_v40  ;;  %1033 = vmatpush1.bf16.msra.mxu0 %v2623_v41 }
 0x2af   :  { %1091 = vmatprep.subr.bf16.mxu1 %v2533_v9  ;;  %1132 = vmatprep.subr.bf16.mxu0 %v2535_v10 }
 0x364   :  { %v897_v54 = vpop.f32.mrb[16].mxu1  ;;  %v938_v56 = vpop.f32.mrb[24].mxu0 }
 0x365   :  { %v945_v3 = vadd.f32 %v897_v54, %v2643_v57  ;;  %v947_v42 = vadd.f32 %v938_v56, %v2646_v58  ;;  %v899_v50 = vpop.f32.mrb[17].mxu1  ;;  %v940_v61 = vpop.f32.mrb[25].mxu0 }
 0x366   :  { %v946_v8 = vadd.f32 %v899_v50, %v510_v51  ;;  %v948_v7 = vadd.f32 %v940_v61, %v2651_v62  ;;  %v901_v4 = vpop.f32.mrb[18].mxu1  ;;  %v942_v55 = vpop.f32.mrb[26].mxu0 }
 0x367   :  { %v949_v47 = vmul.f32 0.5, %v945_v3  ;;  %v902_v44 = vpop.f32.mrb[19].mxu1  ;;  %v943_v52 = vpop.f32.mrb[27].mxu0 }
 0x368   :  { %v953_v60 = vmul.f32 0.5, %v946_v8  ;;  %v958_v59 = vmul.f32 0.5, %v948_v7 }
 0x369   :  { %2202 = vtanh.f32 %v949_v47 }
 0x36a   :  { %2204 = vtanh.f32 %v953_v60 }
 0x36b   :  { %2206 = vtanh.f32 %v947_v42 }
 0x36c   :  { %2208 = vtanh.f32 %v958_v59 }
 0x373   :  { %v2203_v2 = vpop.eup %2202 }
 0x374   :  { %v2205_v1 = vpop.eup %2204  ;;  %v951_v57 = vadd.f32 1.0, %v2203_v2 }
 0x375   :  { %v955_v54 = vadd.f32 1.0, %v2205_v1  ;;  %v2207_v56 = vpop.eup %2206 }
 0x376   :  { %v952_v58 = vmul.f32 0.5, %v951_v57  ;;  %v2209_v52 = vpop.eup %2208 }
 0x377   :  { %v956_v51 = vmul.f32 0.5, %v955_v54  ;;  %v960_v47 = vadd.f32 1.0, %v2209_v52 }
 0x378   :  { %v963_v50 = vmul.f32 %v2207_v56, %v952_v58 }
 0x379   :  { %v962_v62 = vmul.f32 %v956_v51, %v2699_v0  ;;  %v961_v60 = vmul.f32 0.5, %v960_v47 }
 0x37b   :  { %v2776_v55 = vadd.f32 %v963_v50, %v962_v62 }
 0x37d   :  { %2210 = vtanh.f32 %v2776_v55 }
 0x387   :  { %v2211_v44 = vpop.eup %2210 }
 0x388   :  { %v2779_v3 = vmul.f32 %v2211_v44, %v961_v60 }
 0x38a   :  { %v976_v1 = vpack.c.bf16 %v2779_v3, %v2779_v3 }
 0x38c   :  { %1010 = vmatmul.mubr.bf16.vlgmr.msra.gmra.mrb[20].mxu1 %v976_v1  ;;  %1051 = vmatmul.mubr.bf16.vlgmr.msra.gmra.mrb[28].mxu0 %v976_v1 }
 0x38d   :  { %1092 = vmatpush1.bf16.msra.mxu1 %v2537_v11  ;;  %1133 = vmatpush1.bf16.msra.mxu0 %v2539_v12 }
 0x38e   :  { %1093 = vmatprep.subr.bf16.mxu1 %v2545_v13  ;;  %1134 = vmatprep.subr.bf16.mxu0 %v2547_v14 }
 0x38f   :  { %1123 = vmatprep.mubr.bf16.mxu1 %v3143_v45  ;;  %1164 = vmatprep.mubr.bf16.mxu0 %v3143_v45 }
 0x391   :  { %1094 = vmatpush1.bf16.msra.mxu1 %v2549_v15  ;;  %1135 = vmatpush1.bf16.msra.mxu0 %v2551_v16 }
 0x392   :  { %1095 = vmatprep.subr.bf16.mxu1 %v2557_v17  ;;  %1136 = vmatprep.subr.bf16.mxu0 %v2559_v18 }
 0x395   :  { %1096 = vmatpush1.bf16.msra.mxu1 %v2561_v19  ;;  %1137 = vmatpush1.bf16.msra.mxu0 %v2563_v20 }
 0x396   :  { %1097 = vmatprep.subr.bf16.mxu1 %v2569_v21  ;;  %1138 = vmatprep.subr.bf16.mxu0 %v2571_v22 }
 0x399   :  { %1098 = vmatpush1.bf16.msra.mxu1 %v2573_v23  ;;  %1139 = vmatpush1.bf16.msra.mxu0 %v2575_v24 }
 0x39a   :  { %1099 = vmatprep.subr.bf16.mxu1 %v2581_v25  ;;  %1140 = vmatprep.subr.bf16.mxu0 %v2583_v26 }
 0x39d   :  { %1100 = vmatpush1.bf16.msra.mxu1 %v2585_v27  ;;  %1141 = vmatpush1.bf16.msra.mxu0 %v2587_v28 }
 0x39e   :  { %1101 = vmatprep.subr.bf16.mxu1 %v2593_v29  ;;  %1142 = vmatprep.subr.bf16.mxu0 %v2595_v30 }
 0x3a1   :  { %1102 = vmatpush1.bf16.msra.mxu1 %v2597_v31  ;;  %1143 = vmatpush1.bf16.msra.mxu0 %v2599_v33 }
 0x3a2   :  { %1103 = vmatprep.subr.bf16.mxu1 %v2605_v34  ;;  %1144 = vmatprep.subr.bf16.mxu0 %v2607_v35 }
 0x3a5   :  { %1104 = vmatpush1.bf16.msra.mxu1 %v2609_v36  ;;  %1145 = vmatpush1.bf16.msra.mxu0 %v2611_v37 }
 0x3a6   :  { %1105 = vmatprep.subr.bf16.mxu1 %v2617_v38  ;;  %1146 = vmatprep.subr.bf16.mxu0 %v2619_v39 }
 0x3a9   :  { %1106 = vmatpush1.bf16.msra.mxu1 %v2621_v40  ;;  %1147 = vmatpush1.bf16.msra.mxu0 %v2623_v41 }
 0x3aa   :  { %1205 = vmatprep.subr.bf16.mxu1 %v2533_v9  ;;  %1246 = vmatprep.subr.bf16.mxu0 %v2535_v10 }
 0x45f   :  { %v1011_v0 = vpop.f32.mrb[20].mxu1  ;;  %v1052_v42 = vpop.f32.mrb[28].mxu0 }
 0x460   :  { %v1059_v61 = vadd.f32 %v1011_v0, %v2658_v5  ;;  %v1061_v8 = vadd.f32 %v1052_v42, %v2661_v6  ;;  %v1013_v7 = vpop.f32.mrb[21].mxu1  ;;  %v1054_v4 = vpop.f32.mrb[29].mxu0 }
 0x461   :  { %v1060_v59 = vadd.f32 %v1013_v7, %v2664_v43  ;;  %v1062_v2 = vadd.f32 %v1054_v4, %v2667_v46  ;;  %v1015_v57 = vpop.f32.mrb[22].mxu1  ;;  %v1056_v54 = vpop.f32.mrb[30].mxu0 }
 0x462   :  { %v1063_v58 = vmul.f32 0.5, %v1059_v61  ;;  %v1016_v56 = vpop.f32.mrb[23].mxu1  ;;  %v1057_v51 = vpop.f32.mrb[31].mxu0 }
 0x463   :  { %v1067_v50 = vmul.f32 0.5, %v1060_v59  ;;  %v1072_v62 = vmul.f32 0.5, %v1062_v2 }
 0x464   :  { %2212 = vtanh.f32 %v1063_v58 }
 0x465   :  { %2214 = vtanh.f32 %v1067_v50 }
 0x466   :  { %2216 = vtanh.f32 %v1061_v8 }
 0x467   :  { %2218 = vtanh.f32 %v1072_v62 }
 0x46e   :  { %v2213_v52 = vpop.eup %2212 }
 0x46f   :  { %v2215_v5 = vpop.eup %2214  ;;  %v1065_v47 = vadd.f32 1.0, %v2213_v52 }
 0x470   :  { %v1069_v6 = vadd.f32 1.0, %v2215_v5  ;;  %v2217_v44 = vpop.eup %2216 }
 0x471   :  { %v1066_v60 = vmul.f32 0.5, %v1065_v47  ;;  %v2219_v42 = vpop.eup %2218 }
 0x472   :  { %v1070_v43 = vmul.f32 0.5, %v1069_v6  ;;  %v1074_v61 = vadd.f32 1.0, %v2219_v42 }
 0x473   :  { %v1077_v1 = vmul.f32 %v2217_v44, %v1066_v60 }
 0x474   :  { %v1076_v46 = vmul.f32 %v1070_v43, %v2776_v55  ;;  %v1075_v7 = vmul.f32 0.5, %v1074_v61 }
 0x476   :  { %v2822_v0 = vadd.f32 %v1077_v1, %v1076_v46 }
 0x478   :  { %2220 = vtanh.f32 %v2822_v0 }
 0x482   :  { %v2221_v8 = vpop.eup %2220 }
 0x483   :  { %v2825_v4 = vmul.f32 %v2221_v8, %v1075_v7 }
 0x485   :  { %v1090_v59 = vpack.c.bf16 %v2825_v4, %v2825_v4 }
 0x487   :  { %1124 = vmatmul.mubr.bf16.vlgmr.msra.gmra.mrb[24].mxu1 %v1090_v59  ;;  %1165 = vmatmul.mubr.bf16.vlgmr.msra.gmra.mrb[32].mxu0 %v1090_v59 }
 0x488   :  { %1206 = vmatpush1.bf16.msra.mxu1 %v2537_v11  ;;  %1247 = vmatpush1.bf16.msra.mxu0 %v2539_v12 }
 0x489   :  { %1207 = vmatprep.subr.bf16.mxu1 %v2545_v13  ;;  %1248 = vmatprep.subr.bf16.mxu0 %v2547_v14 }
 0x48a   :  { %1237 = vmatprep.mubr.bf16.mxu1 %v3143_v45  ;;  %1278 = vmatprep.mubr.bf16.mxu0 %v3143_v45 }
 0x48c   :  { %1208 = vmatpush1.bf16.msra.mxu1 %v2549_v15  ;;  %1249 = vmatpush1.bf16.msra.mxu0 %v2551_v16 }
 0x48d   :  { %1209 = vmatprep.subr.bf16.mxu1 %v2557_v17  ;;  %1250 = vmatprep.subr.bf16.mxu0 %v2559_v18 }
 0x490   :  { %1210 = vmatpush1.bf16.msra.mxu1 %v2561_v19  ;;  %1251 = vmatpush1.bf16.msra.mxu0 %v2563_v20 }
 0x491   :  { %1211 = vmatprep.subr.bf16.mxu1 %v2569_v21  ;;  %1252 = vmatprep.subr.bf16.mxu0 %v2571_v22 }
 0x494   :  { %1212 = vmatpush1.bf16.msra.mxu1 %v2573_v23  ;;  %1253 = vmatpush1.bf16.msra.mxu0 %v2575_v24 }
 0x495   :  { %1213 = vmatprep.subr.bf16.mxu1 %v2581_v25  ;;  %1254 = vmatprep.subr.bf16.mxu0 %v2583_v26 }
 0x498   :  { %1214 = vmatpush1.bf16.msra.mxu1 %v2585_v27  ;;  %1255 = vmatpush1.bf16.msra.mxu0 %v2587_v28 }
 0x499   :  { %1215 = vmatprep.subr.bf16.mxu1 %v2593_v29  ;;  %1256 = vmatprep.subr.bf16.mxu0 %v2595_v30 }
 0x49c   :  { %1216 = vmatpush1.bf16.msra.mxu1 %v2597_v31  ;;  %1257 = vmatpush1.bf16.msra.mxu0 %v2599_v33 }
 0x49d   :  { %1217 = vmatprep.subr.bf16.mxu1 %v2605_v34  ;;  %1258 = vmatprep.subr.bf16.mxu0 %v2607_v35 }
 0x4a0   :  { %1218 = vmatpush1.bf16.msra.mxu1 %v2609_v36  ;;  %1259 = vmatpush1.bf16.msra.mxu0 %v2611_v37 }
 0x4a1   :  { %1219 = vmatprep.subr.bf16.mxu1 %v2617_v38  ;;  %1260 = vmatprep.subr.bf16.mxu0 %v2619_v39 }
 0x4a4   :  { %1220 = vmatpush1.bf16.msra.mxu1 %v2621_v40  ;;  %1261 = vmatpush1.bf16.msra.mxu0 %v2623_v41 }
 0x4a5   :  { %1319 = vmatprep.subr.bf16.mxu1 %v2533_v9  ;;  %1360 = vmatprep.subr.bf16.mxu0 %v2535_v10 }
 0x55a   :  { %v1125_v55 = vpop.f32.mrb[24].mxu1  ;;  %v1166_v2 = vpop.f32.mrb[32].mxu0 }
 0x55b   :  { %v1173_v57 = vadd.f32 %v1125_v55, %v2670_v48  ;;  %v1175_v54 = vadd.f32 %v1166_v2, %v2673_v49  ;;  %v1127_v58 = vpop.f32.mrb[25].mxu1  ;;  %v1168_v56 = vpop.f32.mrb[33].mxu0 }
 0x55c   :  { %v1174_v51 = vadd.f32 %v1127_v58, %v2676_v53  ;;  %v1176_v50 = vadd.f32 %v1168_v56, %v2679_v32  ;;  %v1129_v62 = vpop.f32.mrb[26].mxu1  ;;  %v1170_v52 = vpop.f32.mrb[34].mxu0 }
 0x55d   :  { %v1177_v5 = vmul.f32 0.5, %v1173_v57  ;;  %v1130_v47 = vpop.f32.mrb[27].mxu1  ;;  %v1171_v6 = vpop.f32.mrb[35].mxu0 }
 0x55e   :  { %v1181_v60 = vmul.f32 0.5, %v1174_v51  ;;  %v1186_v44 = vmul.f32 0.5, %v1176_v50  ;;  %v3144_v51 = vld [vmem:[#allocation11_spill] sm:$0xff]  ;;  %v3146_v6 = vld [vmem:[#allocation13_spill] sm:$0xff] }
 0x55f   :  { %2222 = vtanh.f32 %v1177_v5  ;;  %v3145_v5 = vld [vmem:[#allocation12_spill] sm:$0xff] }
 0x560   :  { %2224 = vtanh.f32 %v1181_v60 }
 0x561   :  { %2226 = vtanh.f32 %v1175_v54 }
 0x562   :  { %2228 = vtanh.f32 %v1186_v44 }
 0x569   :  { %v2223_v43 = vpop.eup %2222 }
 0x56a   :  { %v2225_v48 = vpop.eup %2224  ;;  %v1179_v1 = vadd.f32 1.0, %v2223_v43 }
 0x56b   :  { %v1183_v49 = vadd.f32 1.0, %v2225_v48  ;;  %v2227_v42 = vpop.eup %2226 }
 0x56c   :  { %v1180_v46 = vmul.f32 0.5, %v1179_v1  ;;  %v2229_v8 = vpop.eup %2228 }
 0x56d   :  { %v1184_v53 = vmul.f32 0.5, %v1183_v49  ;;  %v1188_v59 = vadd.f32 1.0, %v2229_v8 }
 0x56e   :  { %v1191_v61 = vmul.f32 %v2227_v42, %v1180_v46 }
 0x56f   :  { %v1190_v32 = vmul.f32 %v1184_v53, %v2822_v0  ;;  %v1189_v55 = vmul.f32 0.5, %v1188_v59 }
 0x571   :  { %v2868_v7 = vadd.f32 %v1191_v61, %v1190_v32 }
 0x573   :  { %2230 = vtanh.f32 %v2868_v7 }
 0x57d   :  { %v2231_v2 = vpop.eup %2230 }
 0x57e   :  { %v2871_v57 = vmul.f32 %v2231_v2, %v1189_v55 }
 0x580   :  { %v1204_v54 = vpack.c.bf16 %v2871_v57, %v2871_v57 }
 0x582   :  { %1238 = vmatmul.mubr.bf16.vlgmr.msra.gmra.mrb[28].mxu1 %v1204_v54  ;;  %1279 = vmatmul.mubr.bf16.vlgmr.msra.gmra.mrb[36].mxu0 %v1204_v54 }
 0x583   :  { %1320 = vmatpush1.bf16.msra.mxu1 %v2537_v11  ;;  %1361 = vmatpush1.bf16.msra.mxu0 %v2539_v12 }
 0x584   :  { %1321 = vmatprep.subr.bf16.mxu1 %v2545_v13  ;;  %1362 = vmatprep.subr.bf16.mxu0 %v2547_v14 }
 0x585   :  { %1351 = vmatprep.mubr.bf16.mxu1 %v3143_v45  ;;  %1392 = vmatprep.mubr.bf16.mxu0 %v3143_v45 }
 0x587   :  { %1322 = vmatpush1.bf16.msra.mxu1 %v2549_v15  ;;  %1363 = vmatpush1.bf16.msra.mxu0 %v2551_v16 }
 0x588   :  { %1323 = vmatprep.subr.bf16.mxu1 %v2557_v17  ;;  %1364 = vmatprep.subr.bf16.mxu0 %v2559_v18 }
 0x58b   :  { %1324 = vmatpush1.bf16.msra.mxu1 %v2561_v19  ;;  %1365 = vmatpush1.bf16.msra.mxu0 %v2563_v20 }
 0x58c   :  { %1325 = vmatprep.subr.bf16.mxu1 %v2569_v21  ;;  %1366 = vmatprep.subr.bf16.mxu0 %v2571_v22 }
 0x58f   :  { %1326 = vmatpush1.bf16.msra.mxu1 %v2573_v23  ;;  %1367 = vmatpush1.bf16.msra.mxu0 %v2575_v24 }
 0x590   :  { %1327 = vmatprep.subr.bf16.mxu1 %v2581_v25  ;;  %1368 = vmatprep.subr.bf16.mxu0 %v2583_v26 }
 0x593   :  { %1328 = vmatpush1.bf16.msra.mxu1 %v2585_v27  ;;  %1369 = vmatpush1.bf16.msra.mxu0 %v2587_v28 }
 0x594   :  { %1329 = vmatprep.subr.bf16.mxu1 %v2593_v29  ;;  %1370 = vmatprep.subr.bf16.mxu0 %v2595_v30 }
 0x597   :  { %1330 = vmatpush1.bf16.msra.mxu1 %v2597_v31  ;;  %1371 = vmatpush1.bf16.msra.mxu0 %v2599_v33 }
 0x598   :  { %1331 = vmatprep.subr.bf16.mxu1 %v2605_v34  ;;  %1372 = vmatprep.subr.bf16.mxu0 %v2607_v35 }
 0x59b   :  { %1332 = vmatpush1.bf16.msra.mxu1 %v2609_v36  ;;  %1373 = vmatpush1.bf16.msra.mxu0 %v2611_v37 }
 0x59c   :  { %1333 = vmatprep.subr.bf16.mxu1 %v2617_v38  ;;  %1374 = vmatprep.subr.bf16.mxu0 %v2619_v39 }
 0x59f   :  { %1334 = vmatpush1.bf16.msra.mxu1 %v2621_v40  ;;  %1375 = vmatpush1.bf16.msra.mxu0 %v2623_v41 }
 0x5a0   :  { %1433 = vmatprep.subr.bf16.mxu1 %v2533_v9  ;;  %1474 = vmatprep.subr.bf16.mxu0 %v2535_v10 }
 0x655   :  { %v1239_v0 = vpop.f32.mrb[28].mxu1  ;;  %v1280_v58 = vpop.f32.mrb[36].mxu0 }
 0x656   :  { %v1287_v56 = vadd.f32 %v1239_v0, %v2682_v63  ;;  %v1289_v50 = vadd.f32 %v1280_v58, %v3144_v51  ;;  %v1241_v62 = vpop.f32.mrb[29].mxu1  ;;  %v1282_v52 = vpop.f32.mrb[37].mxu0 }
 0x657   :  { %v1288_v47 = vadd.f32 %v1241_v62, %v3145_v5  ;;  %v1290_v60 = vadd.f32 %v1282_v52, %v3146_v6  ;;  %v1243_v44 = vpop.f32.mrb[30].mxu1  ;;  %v1284_v43 = vpop.f32.mrb[38].mxu0 }
 0x658   :  { %v1291_v48 = vmul.f32 0.5, %v1287_v56  ;;  %v1244_v1 = vpop.f32.mrb[31].mxu1  ;;  %v1285_v49 = vpop.f32.mrb[39].mxu0 }
 0x659   :  { %v1295_v46 = vmul.f32 0.5, %v1288_v47  ;;  %v1300_v42 = vmul.f32 0.5, %v1290_v60  ;;  %v3149_v47 = vld [vmem:[#allocation16_spill] sm:$0xff]  ;;  %v3150_v60 = vld [vmem:[#allocation17_spill] sm:$0xff] }
 0x65a   :  { %2232 = vtanh.f32 %v1291_v48 }
 0x65b   :  { %2234 = vtanh.f32 %v1295_v46 }
 0x65c   :  { %2236 = vtanh.f32 %v1289_v50 }
 0x65d   :  { %2238 = vtanh.f32 %v1300_v42 }
 0x664   :  { %v2233_v53 = vpop.eup %2232 }
 0x665   :  { %v2235_v63 = vpop.eup %2234  ;;  %v1293_v61 = vadd.f32 1.0, %v2233_v53 }
 0x666   :  { %v1297_v32 = vadd.f32 1.0, %v2235_v63  ;;  %v2237_v59 = vpop.eup %2236 }
 0x667   :  { %v1294_v8 = vmul.f32 0.5, %v1293_v61  ;;  %v2239_v58 = vpop.eup %2238 }
 0x668   :  { %v1298_v55 = vmul.f32 0.5, %v1297_v32  ;;  %v1302_v56 = vadd.f32 1.0, %v2239_v58 }
 0x669   :  { %v1305_v2 = vmul.f32 %v2237_v59, %v1294_v8 }
 0x66a   :  { %v1304_v54 = vmul.f32 %v1298_v55, %v2868_v7  ;;  %v1303_v51 = vmul.f32 0.5, %v1302_v56 }
 0x66c   :  { %v2914_v0 = vadd.f32 %v1305_v2, %v1304_v54 }
 0x66e   :  { %2240 = vtanh.f32 %v2914_v0 }
 0x678   :  { %v2241_v50 = vpop.eup %2240 }
 0x679   :  { %v2917_v62 = vmul.f32 %v2241_v50, %v1303_v51 }
 0x67b   :  { %v1318_v52 = vpack.c.bf16 %v2917_v62, %v2917_v62 }
 0x67d   :  { %1352 = vmatmul.mubr.bf16.vlgmr.msra.gmra.mrb[32].mxu1 %v1318_v52  ;;  %1393 = vmatmul.mubr.bf16.vlgmr.msra.gmra.mrb[40].mxu0 %v1318_v52 }
 0x67e   :  { %1434 = vmatpush1.bf16.msra.mxu1 %v2537_v11  ;;  %1475 = vmatpush1.bf16.msra.mxu0 %v2539_v12 }
 0x67f   :  { %1435 = vmatprep.subr.bf16.mxu1 %v2545_v13  ;;  %1476 = vmatprep.subr.bf16.mxu0 %v2547_v14  ;;  %v3147_v13 = vld [vmem:[#allocation14_spill] sm:$0xff] }
 0x680   :  { %1465 = vmatprep.mubr.bf16.mxu1 %v3143_v45  ;;  %1506 = vmatprep.mubr.bf16.mxu0 %v3143_v45 }
 0x682   :  { %1436 = vmatpush1.bf16.msra.mxu1 %v2549_v15  ;;  %1477 = vmatpush1.bf16.msra.mxu0 %v2551_v16  ;;  %v3148_v15 = vld [vmem:[#allocation15_spill] sm:$0xff] }
 0x683   :  { %1437 = vmatprep.subr.bf16.mxu1 %v2557_v17  ;;  %1478 = vmatprep.subr.bf16.mxu0 %v2559_v18 }
 0x686   :  { %1438 = vmatpush1.bf16.msra.mxu1 %v2561_v19  ;;  %1479 = vmatpush1.bf16.msra.mxu0 %v2563_v20 }
 0x687   :  { %1439 = vmatprep.subr.bf16.mxu1 %v2569_v21  ;;  %1480 = vmatprep.subr.bf16.mxu0 %v2571_v22 }
 0x68a   :  { %1440 = vmatpush1.bf16.msra.mxu1 %v2573_v23  ;;  %1481 = vmatpush1.bf16.msra.mxu0 %v2575_v24 }
 0x68b   :  { %1441 = vmatprep.subr.bf16.mxu1 %v2581_v25  ;;  %1482 = vmatprep.subr.bf16.mxu0 %v2583_v26 }
 0x68e   :  { %1442 = vmatpush1.bf16.msra.mxu1 %v2585_v27  ;;  %1483 = vmatpush1.bf16.msra.mxu0 %v2587_v28 }
 0x68f   :  { %1443 = vmatprep.subr.bf16.mxu1 %v2593_v29  ;;  %1484 = vmatprep.subr.bf16.mxu0 %v2595_v30 }
 0x692   :  { %1444 = vmatpush1.bf16.msra.mxu1 %v2597_v31  ;;  %1485 = vmatpush1.bf16.msra.mxu0 %v2599_v33 }
 0x693   :  { %1445 = vmatprep.subr.bf16.mxu1 %v2605_v34  ;;  %1486 = vmatprep.subr.bf16.mxu0 %v2607_v35 }
 0x696   :  { %1446 = vmatpush1.bf16.msra.mxu1 %v2609_v36  ;;  %1487 = vmatpush1.bf16.msra.mxu0 %v2611_v37 }
 0x697   :  { %1447 = vmatprep.subr.bf16.mxu1 %v2617_v38  ;;  %1488 = vmatprep.subr.bf16.mxu0 %v2619_v39 }
 0x69a   :  { %1448 = vmatpush1.bf16.msra.mxu1 %v2621_v40  ;;  %1489 = vmatpush1.bf16.msra.mxu0 %v2623_v41 }
 0x69b   :  { %1547 = vmatprep.subr.bf16.mxu1 %v2533_v9  ;;  %1588 = vmatprep.subr.bf16.mxu0 %v2535_v10 }
 0x750   :  { %v1353_v11 = vpop.f32.mrb[32].mxu1  ;;  %v1394_v12 = vpop.f32.mrb[40].mxu0 }
 0x751   :  { %v1401_v14 = vadd.f32 %v1353_v11, %v3147_v13  ;;  %v1403_v16 = vadd.f32 %v1394_v12, %v3148_v15  ;;  %v1355_v7 = vpop.f32.mrb[33].mxu1  ;;  %v1396_v5 = vpop.f32.mrb[41].mxu0  ;;  %v2304_v12 = vld [vmem:[#allocation6] ss:$16 sps:$4 sm:$0xff]   ;;  %v2305_v13 = vld [vmem:[#allocation6 + $0x8] ss:$16 sps:$4 sm:$0xff]  }
 0x752   :  { %v1402_v6 = vadd.f32 %v1355_v7, %v3149_v47  ;;  %v1404_v44 = vadd.f32 %v1396_v5, %v3150_v60  ;;  %v1357_v43 = vpop.f32.mrb[34].mxu1  ;;  %v1398_v48 = vpop.f32.mrb[42].mxu0  ;;  %v2308_v15 = vld [vmem:[#allocation6 + $0x20] ss:$16 sps:$4 sm:$0xff]  }
 0x753   :  { %v1405_v1 = vmul.f32 0.5, %v1401_v14  ;;  %v1358_v49 = vpop.f32.mrb[35].mxu1  ;;  %v1399_v46 = vpop.f32.mrb[43].mxu0  ;;  %v2307_v14 = vld [vmem:[#allocation6 + $0x2c] ss:$16 sps:$4 sm:$0xff]  }
 0x754   :  { %v1409_v9 = vmul.f32 0.5, %v1402_v6  ;;  %v1414_v10 = vmul.f32 0.5, %v1404_v44 }
 0x755   :  { %2242 = vtanh.f32 %v1405_v1 }
 0x756   :  { %2244 = vtanh.f32 %v1409_v9  ;;  %v2187_v9 = vld [vmem:[#allocation8 + $0x8] sm:$0xff]  }
 0x757   :  { %2246 = vtanh.f32 %v1403_v16  ;;  %v2309_v16 = vld [vmem:[#allocation6 + $0x28] ss:$16 sps:$4 sm:$0xff]  }
 0x758   :  { %2248 = vtanh.f32 %v1414_v10  ;;  %v3155_v10 = vld [vmem:[#allocation26_spill] sm:$0xff] }
 0x75f   :  { %v2243_v42 = vpop.eup %2242 }
 0x760   :  { %v2245_v53 = vpop.eup %2244  ;;  %v1407_v63 = vadd.f32 1.0, %v2243_v42  ;;  %v1661_v42 = vpack.c.bf16 %v2779_v3, %v3155_v10  ;;  %v2193_v3 = vld [vmem:[#allocation8 + $0x38] sm:$0xff]  }
 0x761   :  { %v1411_v61 = vadd.f32 1.0, %v2245_v53  ;;  %v2247_v8 = vpop.eup %2246  ;;  %v2188_v53 = vld [vmem:[#allocation8 + $0x10] sm:$0xff]  }
 0x762   :  { %v1408_v32 = vmul.f32 0.5, %v1407_v63  ;;  %v2249_v58 = vpop.eup %2248  ;;  %v2189_v63 = vld [vmem:[#allocation8 + $0x18] sm:$0xff]  }
 0x763   :  { %v1412_v59 = vmul.f32 0.5, %v1411_v61  ;;  %v1416_v56 = vadd.f32 1.0, %v2249_v58  ;;  %v2190_v61 = vld [vmem:[#allocation8 + $0x20] sm:$0xff]   ;;  %v3156_v58 = vld [vmem:[#allocation22_spill] sm:$0xff] }
 0x764   :  { %v1419_v55 = vmul.f32 %v2247_v8, %v1408_v32  ;;  %v2191_v32 = vld [vmem:[#allocation8 + $0x28] sm:$0xff]   ;;  %v2192_v8 = vld [vmem:[#allocation8 + $0x30] sm:$0xff]  }
 0x765   :  { %v1418_v2 = vmul.f32 %v1412_v59, %v2914_v0  ;;  %v1417_v51 = vmul.f32 0.5, %v1416_v56  ;;  %v2306_v0 = vld [vmem:[#allocation6 + $0x24] ss:$16 sps:$4 sm:$0xff]   ;;  %v1662_v59 = vpack.c.bf16 %v2871_v57, %v2825_v4 }
 0x767   :  { %v2960_v54 = vadd.f32 %v1419_v55, %v1418_v2 }
 0x769   :  { %2250 = vtanh.f32 %v2960_v54 }
 0x773   :  { %v2251_v50 = vpop.eup %2250 }
 0x774   :  { %v2963_v52 = vmul.f32 %v2251_v50, %v1417_v51  ;;  %v3157_v51 = vld [vmem:[#allocation23_spill] sm:$0xff] }
 0x776   :  { %v1432_v11 = vpack.c.bf16 %v2963_v52, %v2963_v52  ;;  %v1663_v55 = vpack.c.bf16 %v2963_v52, %v2917_v62 }
 0x778   :  { %1466 = vmatmul.mubr.bf16.vlgmr.msra.gmra.mrb[36].mxu1 %v1432_v11  ;;  %1507 = vmatmul.mubr.bf16.vlgmr.msra.gmra.mrb[44].mxu0 %v1432_v11 }
 0x779   :  { %1548 = vmatpush1.bf16.msra.mxu1 %v2304_v12  ;;  %1589 = vmatpush1.bf16.msra.mxu0 %v2305_v13  ;;  %v3158_v13 = vld [vmem:[#allocation24_spill] sm:$0xff] }
 0x77a   :  { %1549 = vmatprep.subr.bf16.mxu1 %v2306_v0  ;;  %1590 = vmatprep.subr.bf16.mxu0 %v2307_v14  ;;  %v3159_v14 = vld [vmem:[#allocation25_spill] sm:$0xff] }
 0x77b   :  { %1579 = vmatprep.mubr.bf16.mxu1 %v3143_v45  ;;  %1620 = vmatprep.mubr.bf16.mxu0 %v3143_v45 }
 0x77d   :  { %1550 = vmatpush1.bf16.msra.mxu1 %v2308_v15  ;;  %1591 = vmatpush1.bf16.msra.mxu0 %v2309_v16 }
 0x77e   :  { %1551 = vmatprep.subr.bf16.mxu1 %v2557_v17  ;;  %1592 = vmatprep.subr.bf16.mxu0 %v2559_v18  ;;  %v2186_v17 = vld [vmem:[#allocation8] sm:$0xff]  }
 0x781   :  { %1552 = vmatpush1.bf16.msra.mxu1 %v2561_v19  ;;  %1593 = vmatpush1.bf16.msra.mxu0 %v2563_v20  ;;  %v3151_v20 = vld [vmem:[#allocation18_spill] sm:$0xff] }
 0x782   :  { %1553 = vmatprep.subr.bf16.mxu1 %v2569_v21  ;;  %1594 = vmatprep.subr.bf16.mxu0 %v2571_v22  ;;  %v3152_v22 = vld [vmem:[#allocation19_spill] sm:$0xff] }
 0x785   :  { %1554 = vmatpush1.bf16.msra.mxu1 %v2573_v23  ;;  %1595 = vmatpush1.bf16.msra.mxu0 %v2575_v24 }
 0x786   :  { %1555 = vmatprep.subr.bf16.mxu1 %v2581_v25  ;;  %1596 = vmatprep.subr.bf16.mxu0 %v2583_v26  ;;  %v3153_v26 = vld [vmem:[#allocation20_spill] sm:$0xff] }
 0x789   :  { %1556 = vmatpush1.bf16.msra.mxu1 %v2585_v27  ;;  %1597 = vmatpush1.bf16.msra.mxu0 %v2587_v28  ;;  %v3154_v28 = vld [vmem:[#allocation21_spill] sm:$0xff] }
 0x78a   :  { %1557 = vmatprep.subr.bf16.mxu1 %v2593_v29  ;;  %1598 = vmatprep.subr.bf16.mxu0 %v2595_v30 }
 0x78d   :  { %1558 = vmatpush1.bf16.msra.mxu1 %v2597_v31  ;;  %1599 = vmatpush1.bf16.msra.mxu0 %v2599_v33 }
 0x78e   :  { %1559 = vmatprep.subr.bf16.mxu1 %v2605_v34  ;;  %1600 = vmatprep.subr.bf16.mxu0 %v2607_v35 }
 0x791   :  { %1560 = vmatpush1.bf16.msra.mxu1 %v2609_v36  ;;  %1601 = vmatpush1.bf16.msra.mxu0 %v2611_v37 }
 0x792   :  { %1561 = vmatprep.subr.bf16.mxu1 %v2617_v38  ;;  %1602 = vmatprep.subr.bf16.mxu0 %v2619_v39 }
 0x795   :  { %1562 = vmatpush1.bf16.msra.mxu1 %v2621_v40  ;;  %1603 = vmatpush1.bf16.msra.mxu0 %v2623_v41 }
 0x796   :  { %2047 = vmatprep.subr.bf16.mxu1 %v2186_v17 }
 0x84b   :  { %v1467_v18 = vpop.f32.mrb[36].mxu1  ;;  %v1508_v19 = vpop.f32.mrb[44].mxu0 }
 0x84c   :  { %v1515_v21 = vadd.f32 %v1467_v18, %v3151_v20  ;;  %v1517_v23 = vadd.f32 %v1508_v19, %v3152_v22  ;;  %v1469_v24 = vpop.f32.mrb[37].mxu1  ;;  %v1510_v25 = vpop.f32.mrb[45].mxu0 }
 0x84d   :  { %v1516_v27 = vadd.f32 %v1469_v24, %v3153_v26  ;;  %v1518_v29 = vadd.f32 %v1510_v25, %v3154_v28  ;;  %v1471_v30 = vpop.f32.mrb[38].mxu1  ;;  %v1512_v31 = vpop.f32.mrb[46].mxu0 }
 0x84e   :  { %v1519_v33 = vmul.f32 0.5, %v1515_v21  ;;  %v1472_v34 = vpop.f32.mrb[39].mxu1  ;;  %v1513_v35 = vpop.f32.mrb[47].mxu0  ;;  %v1990_v31 = vld [vmem:[%s3122_s6] ss:$0 sm:$0xff] }
 0x84f   :  { %v1523_v36 = vmul.f32 0.5, %v1516_v27  ;;  %v1528_v37 = vmul.f32 0.5, %v1518_v29 }
 0x850   :  { %2252 = vtanh.f32 %v1519_v33 }
 0x851   :  { %2254 = vtanh.f32 %v1523_v36 }
 0x852   :  { %2256 = vtanh.f32 %v1517_v23 }
 0x853   :  { %2258 = vtanh.f32 %v1528_v37 }
 0x85a   :  { %v2253_v38 = vpop.eup %2252 }
 0x85b   :  { %v2255_v39 = vpop.eup %2254  ;;  %v1521_v40 = vadd.f32 1.0, %v2253_v38 }
 0x85c   :  { %v1525_v41 = vadd.f32 1.0, %v2255_v39  ;;  %v2257_v7 = vpop.eup %2256 }
 0x85d   :  { %v1522_v45 = vmul.f32 0.5, %v1521_v40  ;;  %v2259_v44 = vpop.eup %2258 }
 0x85e   :  { %v1526_v5 = vmul.f32 0.5, %v1525_v41  ;;  %v1530_v43 = vadd.f32 1.0, %v2259_v44 }
 0x85f   :  { %v1533_v47 = vmul.f32 %v2257_v7, %v1522_v45 }
 0x860   :  { %v1532_v6 = vmul.f32 %v1526_v5, %v2960_v54  ;;  %v1531_v48 = vmul.f32 0.5, %v1530_v43 }
 0x862   :  { %v2998_v60 = vadd.f32 %v1533_v47, %v1532_v6 }
 0x864   :  { %2260 = vtanh.f32 %v2998_v60 }
 0x86e   :  { %v2261_v1 = vpop.eup %2260 }
 0x86f   :  { %v3001_v49 = vmul.f32 %v2261_v1, %v1531_v48 }
 0x871   :  { %v1546_v46 = vpack.c.bf16 %v3001_v49, %v3001_v49 }
 0x873   :  { %1580 = vmatmul.mubr.bf16.vlgmr.msra.gmra.mrb[40].mxu1 %v1546_v46  ;;  %1621 = vmatmul.mubr.bf16.vlgmr.msra.gmra.mrb[48].mxu0 %v1546_v46 }
 0x874   :  { %2048 = vmatpush3.bf16.msra.mxu1 %v2186_v17  ;;  %2063 = vmatprep.mubr.bf16.mxu1 %v1661_v42 }
 0x875   :  { %2049 = vmatprep.subr.bf16.mxu1 %v2187_v9 }
 0x878   :  { %2050 = vmatpush3.bf16.msra.mxu1 %v2187_v9 }
 0x879   :  { %2051 = vmatprep.subr.bf16.mxu1 %v2188_v53 }
 0x87c   :  { %2052 = vmatpush3.bf16.msra.mxu1 %v2188_v53 }
 0x87d   :  { %2053 = vmatprep.subr.bf16.mxu1 %v2189_v63 }
 0x880   :  { %2054 = vmatpush3.bf16.msra.mxu1 %v2189_v63 }
 0x881   :  { %2055 = vmatprep.subr.bf16.mxu1 %v2190_v61 }
 0x884   :  { %2056 = vmatpush3.bf16.msra.mxu1 %v2190_v61 }
 0x885   :  { %2057 = vmatprep.subr.bf16.mxu1 %v2191_v32 }
 0x888   :  { %2058 = vmatpush3.bf16.msra.mxu1 %v2191_v32 }
 0x889   :  { %2059 = vmatprep.subr.bf16.mxu1 %v2192_v8 }
 0x88c   :  { %2060 = vmatpush3.bf16.msra.mxu1 %v2192_v8 }
 0x88d   :  { %2061 = vmatprep.subr.bf16.mxu1 %v2193_v3 }
 0x890   :  { %2062 = vmatpush3.bf16.msra.mxu1 %v2193_v3 }
 0x893   :  { %2064 = vmatmul.mubr.bf16.vlgmr.msra.gmra.mrb[44].mxu1 %v1662_v59 }
 0x894   :  { %2067 = vmatprep.mubr.bf16.mxu1 %v1663_v55 }
 0x946   :  { %v1581_v2 = vpop.f32.mrb[40].mxu1  ;;  %v1622_v54 = vpop.f32.mrb[48].mxu0 }
 0x947   :  { %v1629_v56 = vadd.f32 %v1581_v2, %v3156_v58  ;;  %v1631_v50 = vadd.f32 %v1622_v54, %v3157_v51  ;;  %v1583_v11 = vpop.f32.mrb[41].mxu1  ;;  %v1624_v12 = vpop.f32.mrb[49].mxu0 }
 0x948   :  { %v1630_v0 = vadd.f32 %v1583_v11, %v3158_v13  ;;  %v1632_v15 = vadd.f32 %v1624_v12, %v3159_v14  ;;  %v1585_v16 = vpop.f32.mrb[42].mxu1  ;;  %v1626_v17 = vpop.f32.mrb[50].mxu0 }
 0x949   :  { %v1633_v4 = vmul.f32 0.5, %v1629_v56  ;;  %v1586_v57 = vpop.f32.mrb[43].mxu1  ;;  %v1627_v18 = vpop.f32.mrb[51].mxu0 }
 0x94a   :  { %v1637_v62 = vmul.f32 0.5, %v1630_v0  ;;  %v1642_v52 = vmul.f32 0.5, %v1632_v15 }
 0x94b   :  { %2262 = vtanh.f32 %v1633_v4 }
 0x94c   :  { %2264 = vtanh.f32 %v1637_v62 }
 0x94d   :  { %2266 = vtanh.f32 %v1631_v50 }
 0x94e   :  { %2268 = vtanh.f32 %v1642_v52 }
 0x955   :  { %v2263_v19 = vpop.eup %2262 }
 0x956   :  { %v2265_v20 = vpop.eup %2264  ;;  %v1635_v21 = vadd.f32 1.0, %v2263_v19 }
 0x957   :  { %v1639_v22 = vadd.f32 1.0, %v2265_v20  ;;  %v2267_v24 = vpop.eup %2266 }
 0x958   :  { %v1636_v23 = vmul.f32 0.5, %v1635_v21  ;;  %v2269_v29 = vpop.eup %2268 }
 0x959   :  { %v1640_v25 = vmul.f32 0.5, %v1639_v22  ;;  %v1644_v30 = vadd.f32 1.0, %v2269_v29 }
 0x95a   :  { %v1647_v26 = vmul.f32 %v2267_v24, %v1636_v23 }
 0x95b   :  { %v1646_v27 = vmul.f32 %v1640_v25, %v2998_v60  ;;  %v1645_v36 = vmul.f32 0.5, %v1644_v30 }
 0x95d   :  { %v1648_v28 = vadd.f32 %v1647_v26, %v1646_v27 }
 0x95f   :  { %2270 = vtanh.f32 %v1648_v28 }
 0x966   :  { %v2065_v33 = vpop.f32.mrb[44].mxu1 }
 0x967   :  { %v3019_v34 = vadd.f32 %v2065_v33, %v1990_v31  ;;  %v1770_v35 = vpop.f32.mrb[45].mxu1 }
 0x968   :  { %v2066_v37 = vpop.f32.mrb[46].mxu1  ;;  %v3024_v45 = vadd.f32 %v1990_v31, %v1770_v35 }
 0x969   :  { %v2271_v38 = vpop.eup %2270  ;;  %1805 = vmax.xlane.f32.xlu0 %v3019_v34  ;;  %v1773_v39 = vpop.f32.mrb[47].mxu1  ;;  %v3029_v5 = vadd.f32 %v2066_v37, %v1990_v31 }
 0x96a   :  { %v3022_v40 = vadd.f32 %v1990_v31, %v1773_v39  ;;  %v1650_v41 = vmul.f32 %v2271_v38, %v1645_v36 }
 0x96c   :  { %1803 = vmax.xlane.f32.xlu1 %v3022_v40  ;;  %v1664_v7 = vpack.c.bf16 %v1650_v41, %v3001_v49 }
 0x96d   :  { %1801 = vmax.xlane.f32.xlu0 %v3024_v45 }
 0x96e   :  { %2068 = vmatmul.mubr.bf16.gmra.mrb[48].mxu1 %v1664_v7 }
 0x971   :  { %1807 = vmax.xlane.f32.xlu0 %v3029_v5 }
 0x9f6   :  { %v3032_v47 = vpop.xlane.xlu0 %1805 }
 0x9f7   :  { %v1819_v1 = vsub.f32 %v3019_v34, %v3032_v47 }
 0x9f9   :  { %v3036_v60 = vpop.xlane.xlu1 %1803  ;;  %v1829_v42 = vmul.f32 1.442695, %v1819_v1 }
 0x9fa   :  { %v3034_v6 = vpop.xlane.xlu0 %1801  ;;  %v1818_v43 = vsub.f32 %v3022_v40, %v3036_v60 }
 0x9fb   :  { %v1817_v44 = vsub.f32 %v3024_v45, %v3034_v6 }
 0x9fc   :  { %v1827_v46 = vmul.f32 1.442695, %v1818_v43 }
 0x9fd   :  { %v1825_v49 = vmul.f32 1.442695, %v1817_v44 }
 0x9fe   :  { %v3042_v48 = vpop.xlane.xlu0 %1807 }
 0x9ff   :  { %v1820_v9 = vsub.f32 %v3029_v5, %v3042_v48  ;;  %2272 = vpow2.f32 %v1825_v49 }
 0xa00   :  { %2274 = vpow2.f32 %v1827_v46 }
 0xa01   :  { %v1831_v32 = vmul.f32 1.442695, %v1820_v9  ;;  %2276 = vpow2.f32 %v1829_v42 }
 0xa03   :  { %2278 = vpow2.f32 %v1831_v32 }
 0xa09   :  { %v2273_v2 = vpop.eup %2272 }
 0xa0a   :  { %v2275_v54 = vpop.eup %2274 }
 0xa0b   :  { %v2277_v58 = vpop.eup %2276 }
 0xa0d   :  { %v2279_v56 = vpop.eup %2278 }
 0xa41   :  { %v2069_v10 = vpop.f32.mrb[48].mxu1 }
 0xa42   :  { %v1786_v53 = vpop.f32.mrb[49].mxu1  ;;  %v3053_v59 = vadd.f32 %v2069_v10, %v1990_v31 }
 0xa43   :  { %v3048_v63 = vadd.f32 %v1990_v31, %v1786_v53  ;;  %v2070_v61 = vpop.f32.mrb[50].mxu1 }
 0xa44   :  { %v1789_v8 = vpop.f32.mrb[51].mxu1  ;;  %v3056_v55 = vadd.f32 %v2070_v61, %v1990_v31 }
 0xa45   :  { %v3050_v3 = vadd.f32 %v1990_v31, %v1789_v8  ;;  %1809 = vmax.xlane.f32.xlu1 %v3048_v63 }
 0xa47   :  { %1811 = vmax.xlane.f32.xlu0 %v3050_v3 }
 0xa49   :  { %1813 = vmax.xlane.f32.xlu1 %v3053_v59 }
 0xa4b   :  { %1815 = vmax.xlane.f32.xlu0 %v3056_v55 }
 0xa4d   :  { %1841 = vadd.xlane.f32.xlu1 %v2273_v2 }
 0xa4f   :  { %1843 = vadd.xlane.f32.xlu0 %v2275_v54 }
 0xa51   :  { %1845 = vadd.xlane.f32.xlu1 %v2277_v58 }
 0xa53   :  { %1847 = vadd.xlane.f32.xlu0 %v2279_v56 }
 0xad2   :  { %v3060_v51 = vpop.xlane.xlu1 %1809 }
 0xad3   :  { %v1821_v50 = vsub.f32 %v3048_v63, %v3060_v51 }
 0xad4   :  { %v3064_v11 = vpop.xlane.xlu0 %1811 }
 0xad5   :  { %v1833_v12 = vmul.f32 1.442695, %v1821_v50  ;;  %v1822_v13 = vsub.f32 %v3050_v3, %v3064_v11 }
 0xad6   :  { %v3068_v0 = vpop.xlane.xlu1 %1813 }
 0xad7   :  { %2280 = vpow2.f32 %v1833_v12  ;;  %v1835_v14 = vmul.f32 1.442695, %v1822_v13  ;;  %v1823_v15 = vsub.f32 %v3053_v59, %v3068_v0 }
 0xad8   :  { %v3072_v16 = vpop.xlane.xlu0 %1815 }
 0xad9   :  { %2282 = vpow2.f32 %v1835_v14  ;;  %v1837_v17 = vmul.f32 1.442695, %v1823_v15  ;;  %v1824_v4 = vsub.f32 %v3056_v55, %v3072_v16 }
 0xada   :  { %v1842_v57 = vpop.xlane.xlu1 %1841 }
 0xadb   :  { %2284 = vpow2.f32 %v1837_v17  ;;  %v1839_v18 = vmul.f32 1.442695, %v1824_v4 }
 0xadc   :  { %2286 = vlog2.f32 %v1842_v57  ;;  %v1844_v62 = vpop.xlane.xlu0 %1843 }
 0xadd   :  { %2288 = vpow2.f32 %v1839_v18 }
 0xade   :  { %2290 = vlog2.f32 %v1844_v62  ;;  %v1846_v52 = vpop.xlane.xlu1 %1845 }
 0xadf   :  { %2292 = vlog2.f32 %v1846_v52 }
 0xae0   :  { %v1848_v19 = vpop.xlane.xlu0 %1847 }
 0xae1   :  { %v2281_v20 = vpop.eup %2280  ;;  %2294 = vlog2.f32 %v1848_v19 }
 0xae2   :  { %1849 = vadd.xlane.f32.xlu1 %v2281_v20 }
 0xae3   :  { %v2283_v21 = vpop.eup %2282 }
 0xae4   :  { %1851 = vadd.xlane.f32.xlu0 %v2283_v21 }
 0xae5   :  { %v2285_v22 = vpop.eup %2284 }
 0xae6   :  { %v2287_v23 = vpop.eup %2286  ;;  %1853 = vadd.xlane.f32.xlu1 %v2285_v22 }
 0xae7   :  { %v2289_v24 = vpop.eup %2288  ;;  %v1858_v25 = vmul.f32 0.6931472, %v2287_v23 }
 0xae8   :  { %v2291_v26 = vpop.eup %2290  ;;  %1855 = vadd.xlane.f32.xlu0 %v2289_v24 }
 0xae9   :  { %v2293_v27 = vpop.eup %2292  ;;  %v1873_v28 = vadd.f32 %v1858_v25, %v3034_v6  ;;  %v1860_v29 = vmul.f32 0.6931472, %v2291_v26 }
 0xaea   :  { %v1862_v30 = vmul.f32 0.6931472, %v2293_v27 }
 0xaeb   :  { %v2295_v31 = vpop.eup %2294  ;;  %v1881_v33 = vsub.f32 %v3024_v45, %v1873_v28  ;;  %v1874_v35 = vadd.f32 %v1860_v29, %v3036_v60 }
 0xaec   :  { %v1875_v36 = vadd.f32 %v1862_v30, %v3032_v47  ;;  %v1864_v37 = vmul.f32 0.6931472, %v2295_v31 }
 0xaed   :  { %1889 = vst [vmem:[%s3123_s7] sm:$0xff] %v1881_v33  ;;  %v1882_v38 = vsub.f32 %v3022_v40, %v1874_v35 }
 0xaee   :  { %v1883_v39 = vsub.f32 %v3019_v34, %v1875_v36  ;;  %v1876_v41 = vadd.f32 %v1864_v37, %v3042_v48 }
 0xaef   :  { %1890 = vst [vmem:[%s3123_s7 + $0x8] sm:$0xff] %v1882_v38 }
 0xaf0   :  { %1891 = vst [vmem:[%s3123_s7 + $0x10] sm:$0xff] %v1883_v39  ;;  %v1884_v45 = vsub.f32 %v3029_v5, %v1876_v41 }
 0xaf2   :  { %1892 = vst [vmem:[%s3123_s7 + $0x18] sm:$0xff] %v1884_v45 }
 0xb6f   :  { %v1850_v7 = vpop.xlane.xlu1 %1849 }
 0xb70   :  { %2296 = vlog2.f32 %v1850_v7 }
 0xb71   :  { %v1852_v40 = vpop.xlane.xlu0 %1851 }
 0xb72   :  { %2298 = vlog2.f32 %v1852_v40 }
 0xb73   :  { %v1854_v34 = vpop.xlane.xlu1 %1853 }
 0xb74   :  { %2300 = vlog2.f32 %v1854_v34 }
 0xb75   :  { %v1856_v47 = vpop.xlane.xlu0 %1855 }
 0xb76   :  { %2302 = vlog2.f32 %v1856_v47 }
 0xb7a   :  { %v2297_v6 = vpop.eup %2296 }
 0xb7b   :  { %v1866_v60 = vmul.f32 0.6931472, %v2297_v6 }
 0xb7c   :  { %v2299_v44 = vpop.eup %2298 }
 0xb7d   :  { %v1877_v43 = vadd.f32 %v1866_v60, %v3060_v51  ;;  %v1868_v48 = vmul.f32 0.6931472, %v2299_v44 }
 0xb7e   :  { %v2301_v1 = vpop.eup %2300 }
 0xb7f   :  { %v1885_v5 = vsub.f32 %v3048_v63, %v1877_v43  ;;  %v1878_v49 = vadd.f32 %v1868_v48, %v3064_v11  ;;  %v1870_v46 = vmul.f32 0.6931472, %v2301_v1 }
 0xb80   :  { %v2303_v9 = vpop.eup %2302 }
 0xb81   :  { %1893 = vst [vmem:[%s3123_s7 + $0x20] sm:$0xff] %v1885_v5  ;;  %v1886_v10 = vsub.f32 %v3050_v3, %v1878_v49  ;;  %v1879_v42 = vadd.f32 %v1870_v46, %v3068_v0  ;;  %v1872_v53 = vmul.f32 0.6931472, %v2303_v9 }
 0xb83   :  { %1894 = vst [vmem:[%s3123_s7 + $0x28] sm:$0xff] %v1886_v10  ;;  %v1887_v61 = vsub.f32 %v3053_v59, %v1879_v42  ;;  %v1880_v63 = vadd.f32 %v1872_v53, %v3072_v16 }
 0xb85   :  { %1895 = vst [vmem:[%s3123_s7 + $0x30] sm:$0xff] %v1887_v61  ;;  %v1888_v32 = vsub.f32 %v3056_v55, %v1880_v63 }
 0xb87   :  { %1896 = vst [vmem:[%s3123_s7 + $0x38] sm:$0xff] %v1888_v32 }
 0xb88   :  { %1901 = vsyncpa [#allocation5], 1 }
 0xb89   :  { %1902 = vsyncpa [#allocation7], 1 }

</bundles_post_ra>
